<compile_context>
chip_gen: v6e
topology: v6e:2x2x1
jax: 0.10.0
libtpu: 0.0.40
codegen_flags: <defaults>
</compile_context>

<pallas_src>
import math
import numpy as np
import jax
import jax.numpy as jnp
from jax.experimental import pallas as pl
from jax.experimental.pallas import tpu as pltpu

NUM_GROUPS = 32
EPS = 1e-6


# ---------------------------------------------------------------------------
# Generation-aware VMEM budget and tile selection
# ---------------------------------------------------------------------------
def _vmem_budget_bytes():
    """VMEM budget (bytes) with headroom for Mosaic-internal scratch."""
    try:
        cap = int(pltpu.get_tpu_info().vmem_capacity_bytes)
    except Exception:
        cap = 64 * 1024 * 1024            # conservative (v7x-sized) fallback
    # v7x (64 MiB physical) -> ~48 MiB; v5e/v6e (128 MiB) -> ~96 MiB (capped)
    return min(cap * 3 // 4, 100 * 1024 * 1024)


def _tile_candidates(n, cap):
    """Lane-friendly tile sizes: multiples of 128 dividing n (<= cap), plus n."""
    cands = {t for t in range(128, min(n, cap) + 1, 128) if n % t == 0}
    if not cands or n <= cap:
        cands.add(n)
    return sorted(cands, reverse=True)


def _k2_vmem(tn, C):
    bf, f = 2, 4
    return (2 * C * tn * f                      # x block (double-buffered)
            + 2 * 2 * C * f                     # per-channel affine a/b
            + 2 * 3 * (C * C * bf + C * f)      # weights + biases
            + 2 * 3 * tn * C * bf               # q/k/v output blocks
            + 4 * tn * C * f)                   # in-kernel temporaries


def _k3_vmem(tq, tk, C):
    bf, f = 2, 4
    return (2 * tq * C * bf + 2 * C * tk * bf + 2 * tk * C * bf   # q, k, v
            + 2 * C * tq * f + 2 * C * tq * f                     # x, out
            + 2 * (C * C * bf + C * f)                            # Wp, bp
            + tq * C * f + 2 * tq * f                             # acc, m, l
            + 3 * tq * tk * f                                     # s / p tiles
            + 3 * tq * C * f)                                     # epilogue temps


def _select_tiles(B, N, C, budget):
    # token tile for streaming / projection kernels (review: prefer >= 512)
    tn_cands = _tile_candidates(N, 1024)
    tn = next((t for t in tn_cands if _k2_vmem(t, C) <= budget), tn_cands[-1])

    # attention tiles: large q-tile (fewer K/V re-reads); kv-tile = N when K/V
    # (plus the (tq, tk) f32 score tile) fit residently in VMEM.
    tq_cands = _tile_candidates(N, 1024 if C <= 512 else 512)
    tk_cands = _tile_candidates(N, N)
    for tq in tq_cands:
        # keep >= 2 parallel (b, q-tile) units so v7x's 2 TensorCores stay busy
        if B * (N // tq) < 2 and tq != tq_cands[-1]:
            continue
        for tk in tk_cands:
            if _k3_vmem(tq, tk, C) <= budget:
                return tn, tq, tk
    return tn, tq_cands[-1], tk_cands[-1]


# ---------------------------------------------------------------------------
# Kernel 1: GroupNorm statistics — per-(batch, channel) sums of x and x^2.
# grid = (B, N // tn); x arrives channel-major (B, C, N). Lane-replicated
# accumulators: per step only VPU adds; the single cross-lane reduce happens
# in the last-step finalize.
# ---------------------------------------------------------------------------
def _gn_stats_kernel(x_ref, s1_ref, s2_ref, acc1, acc2):
    ni = pl.program_id(1)

    @pl.when(ni == 0)
    def _():
        acc1[...] = jnp.zeros_like(acc1)
        acc2[...] = jnp.zeros_like(acc2)

    x = x_ref[0].astype(jnp.float32)                  # (C, tn)
    lane = acc1.shape[1]
    for j in range(x.shape[1] // lane):               # static, 128-aligned slices
        blk = x[:, j * lane:(j + 1) * lane]
        acc1[...] += blk
        acc2[...] += blk * blk

    @pl.when(ni == pl.num_programs(1) - 1)
    def _():
        s1_ref[0] = jnp.sum(acc1[...], axis=1, keepdims=True)   # (C, 1)
        s2_ref[0] = jnp.sum(acc2[...], axis=1, keepdims=True)


# ---------------------------------------------------------------------------
# Kernel 2: fused GroupNorm affine + q/k/v projections (1x1 convs as matmuls).
#   h = x * a + b                      (GroupNorm folded to per-channel affine)
#   q = (h^T @ WqT + bq) * C^-1/2      (scale pre-folded into WqT / bq)
#   k = Wk @ h + bk                    (channel-major: no transpose downstream)
#   v = h^T @ WvT + bv
# Single bf16 transpose per tile (cast first). grid = (B, N // tn).
# ---------------------------------------------------------------------------
def _qkv_proj_kernel(x_ref, a_ref, b_ref,
                     wq_ref, bq_ref, wk_ref, bk_ref, wv_ref, bv_ref,
                     q_ref, k_ref, v_ref):
    x = x_ref[0].astype(jnp.float32)                          # (C, tn)
    h_cm = (x * a_ref[0] + b_ref[0]).astype(jnp.bfloat16)     # (C, tn) bf16
    h_tok = h_cm.T                                            # (tn, C) bf16 (XLU)

    q = jnp.dot(h_tok, wq_ref[...], preferred_element_type=jnp.float32) + bq_ref[...]
    v = jnp.dot(h_tok, wv_ref[...], preferred_element_type=jnp.float32) + bv_ref[...]
    k = jnp.dot(wk_ref[...], h_cm, preferred_element_type=jnp.float32) + bk_ref[...]

    q_ref[0] = q.astype(jnp.bfloat16)                         # (tn, C)
    v_ref[0] = v.astype(jnp.bfloat16)                         # (tn, C)
    k_ref[0] = k.astype(jnp.bfloat16)                         # (C, tn)


# ---------------------------------------------------------------------------
# Kernel 3: flash-style attention + output projection + residual.
# grid = (B, N//tq, N//tk); kv axis innermost ("arbitrary"); b / q-tile axes
# "parallel". When tk == N the K/V blocks are resident per batch and the loop
# collapses to a single-pass softmax.
# ---------------------------------------------------------------------------
def _flash_attn_kernel(q_ref, k_ref, v_ref, x_ref, wp_ref, bp_ref, o_ref,
                       m_sc, l_sc, acc_sc):
    ki = pl.program_id(2)

    @pl.when(ki == 0)
    def _():
        m_sc[...] = jnp.full_like(m_sc, -jnp.inf)
        l_sc[...] = jnp.zeros_like(l_sc)
        acc_sc[...] = jnp.zeros_like(acc_sc)

    # q already carries C^-1/2; k is channel-major -> plain NN matmul on MXU.
    s = jnp.dot(q_ref[0], k_ref[0], preferred_element_type=jnp.float32)  # (tq, tk)

    m_prev = m_sc[...]
    m_new = jnp.maximum(m_prev, jnp.max(s, axis=-1, keepdims=True))      # (tq, 1)
    alpha = jnp.exp(m_prev - m_new)
    p = jnp.exp(s - m_new)                                               # (tq, tk)
    l_sc[...] = alpha * l_sc[...] + jnp.sum(p, axis=-1, keepdims=True)
    acc_sc[...] = alpha * acc_sc[...] + jnp.dot(
        p.astype(jnp.bfloat16), v_ref[0], preferred_element_type=jnp.float32)
    m_sc[...] = m_new

    @pl.when(ki == pl.num_programs(2) - 1)
    def _():
        # deferred softmax normalization: EUP reciprocal, O(tq*C) multiplies.
        out = acc_sc[...] * pl.reciprocal(l_sc[...], approx=True)        # (tq, C)
        proj = jnp.dot(out.astype(jnp.bfloat16), wp_ref[...],
                       preferred_element_type=jnp.float32) + bp_ref[...]
        # residual add; write back channel-major (matches NCHW input layout).
        o_ref[0] = (x_ref[0] + proj.T).astype(o_ref.dtype)


def attn_block(x_nchw, params):
    """VQGAN AttnBlock forward. x_nchw: (B, C, H, W) float32 -> (B, C, H, W)."""
    B, C, H, W = x_nchw.shape
    assert C % NUM_GROUPS == 0, "GroupNorm(32) requires C % 32 == 0"
    N = H * W
    gs = C // NUM_GROUPS
    f32, bf16 = jnp.float32, jnp.bfloat16

    x_cn = x_nchw.reshape(B, C, N)            # channel-major tokens (free reshape)

    vmem_budget = _vmem_budget_bytes()
    tn, tq, tk = _select_tiles(B, N, C, vmem_budget)
    for t in (tn, tq, tk):                    # lane-dense guard (review item)
        assert N % t == 0 and (t % 128 == 0 or t == N), (t, N)
    lane = 128 if tn % 128 == 0 else tn       # stats accumulator lane width

    # ---- parameter prep (tiny, trace/XLA side) -----------------------------
    scale = 1.0 / math.sqrt(C)
    gamma = params["norm_weight"].astype(f32)
    beta = params["norm_bias"].astype(f32)
    # conv weights are (Cout, Cin, 1, 1)
    wq_t = (params["q_weight"].reshape(C, C).T * scale).astype(bf16)   # h @ WqT
    bq_r = (params["q_bias"] * scale).reshape(1, C).astype(f32)
    wk_oc = params["k_weight"].reshape(C, C).astype(bf16)              # Wk @ h
    bk_c = params["k_bias"].reshape(C, 1).astype(f32)
    wv_t = params["v_weight"].reshape(C, C).T.astype(bf16)
    bv_r = params["v_bias"].reshape(1, C).astype(f32)
    wp_t = params["proj_weight"].reshape(C, C).T.astype(bf16)
    bp_r = params["proj_bias"].reshape(1, C).astype(f32)

    def cparams(sem):
        return pltpu.CompilerParams(dimension_semantics=sem,
                                    vmem_limit_bytes=int(vmem_budget))

    # ---- 1) GroupNorm statistics (streaming reduction over N) --------------
    s1, s2 = pl.pallas_call(
        _gn_stats_kernel,
        out_shape=(jax.ShapeDtypeStruct((B, C, 1), f32),
                   jax.ShapeDtypeStruct((B, C, 1), f32)),
        grid=(B, N // tn),
        in_specs=[pl.BlockSpec((1, C, tn), lambda b, n: (b, 0, n))],
        out_specs=(pl.BlockSpec((1, C, 1), lambda b, n: (b, 0, 0)),
                   pl.BlockSpec((1, C, 1), lambda b, n: (b, 0, 0))),
        scratch_shapes=[pltpu.VMEM((C, lane), f32), pltpu.VMEM((C, lane), f32)],
        compiler_params=cparams(("parallel", "arbitrary")),
    )(x_cn)

    # group-wise finalize on tiny (B, C) arrays (plain JAX glue; negligible)
    # TODO(synk): E[x^2]-E[x]^2 in f32 can cancel for large-mean activations;
    # use a shifted accumulation if tighter parity with torch is needed.
    inv_cnt = 1.0 / float(N * gs)
    g_mean = s1.reshape(B, NUM_GROUPS, gs).sum(-1) * inv_cnt            # (B, 32)
    g_ex2 = s2.reshape(B, NUM_GROUPS, gs).sum(-1) * inv_cnt
    g_inv = jax.lax.rsqrt(g_ex2 - g_mean * g_mean + EPS)
    mean_c = jnp.repeat(g_mean, gs, axis=1)                             # (B, C)
    inv_c = jnp.repeat(g_inv, gs, axis=1)
    a_bc = (inv_c * gamma[None, :]).reshape(B, C, 1)                    # scale
    b_bc = (beta[None, :] - mean_c * inv_c * gamma[None, :]).reshape(B, C, 1)

    # ---- 2) fused GroupNorm + q/k/v projections ----------------------------
    q_tok, k_cm, v_tok = pl.pallas_call(
        _qkv_proj_kernel,
        out_shape=(jax.ShapeDtypeStruct((B, N, C), bf16),
                   jax.ShapeDtypeStruct((B, C, N), bf16),
                   jax.ShapeDtypeStruct((B, N, C), bf16)),
        grid=(B, N // tn),
        in_specs=[
            pl.BlockSpec((1, C, tn), lambda b, n: (b, 0, n)),   # x slab
            pl.BlockSpec((1, C, 1), lambda b, n: (b, 0, 0)),    # a = inv*gamma
            pl.BlockSpec((1, C, 1), lambda b, n: (b, 0, 0)),    # b = shift
            pl.BlockSpec((C, C), lambda b, n: (0, 0)),          # WqT * scale
            pl.BlockSpec((1, C), lambda b, n: (0, 0)),          # bq * scale
            pl.BlockSpec((C, C), lambda b, n: (0, 0)),          # Wk (out, in)
            pl.BlockSpec((C, 1), lambda b, n: (0, 0)),          # bk column
            pl.BlockSpec((C, C), lambda b, n: (0, 0)),          # WvT
            pl.BlockSpec((1, C), lambda b, n: (0, 0)),          # bv
        ],
        out_specs=(pl.BlockSpec((1, tn, C), lambda b, n: (b, n, 0)),
                   pl.BlockSpec((1, C, tn), lambda b, n: (b, 0, n)),
                   pl.BlockSpec((1, tn, C), lambda b, n: (b, n, 0))),
        compiler_params=cparams(("parallel", "parallel")),
    )(x_cn, a_bc, b_bc, wq_t, bq_r, wk_oc, bk_c, wv_t, bv_r)

    # ---- 3) flash attention + proj_out + residual --------------------------
    out_cn = pl.pallas_call(
        _flash_attn_kernel,
        out_shape=jax.ShapeDtypeStruct((B, C, N), x_cn.dtype),
        grid=(B, N // tq, N // tk),
        in_specs=[
            pl.BlockSpec((1, tq, C), lambda b, qi, ki: (b, qi, 0)),  # q
            pl.BlockSpec((1, C, tk), lambda b, qi, ki: (b, 0, ki)),  # k (C-major)
            pl.BlockSpec((1, tk, C), lambda b, qi, ki: (b, ki, 0)),  # v
            pl.BlockSpec((1, C, tq), lambda b, qi, ki: (b, 0, qi)),  # x residual
            pl.BlockSpec((C, C), lambda b, qi, ki: (0, 0)),          # WpT
            pl.BlockSpec((1, C), lambda b, qi, ki: (0, 0)),          # bp
        ],
        out_specs=pl.BlockSpec((1, C, tq), lambda b, qi, ki: (b, 0, qi)),
        scratch_shapes=[pltpu.VMEM((tq, 1), f32),
                        pltpu.VMEM((tq, 1), f32),
                        pltpu.VMEM((tq, C), f32)],
        compiler_params=cparams(("parallel", "parallel", "arbitrary")),
    )(q_tok, k_cm, v_tok, x_cn, wp_t, bp_r)

    return out_cn.reshape(B, C, H, W)


# ---------------------------------------------------------------------------
# Pure-JAX f32 reference mirroring the PyTorch module (NCHW).
# ---------------------------------------------------------------------------
def reference_attn_block(x, params):
    B, C, H, W = x.shape
    gs = C // NUM_GROUPS
    xg = x.reshape(B, NUM_GROUPS, gs, H, W)
    mean = xg.mean(axis=(2, 3, 4), keepdims=True)
    var = xg.var(axis=(2, 3, 4), keepdims=True)
    hn = ((xg - mean) / jnp.sqrt(var + EPS)).reshape(B, C, H, W)
    hn = hn * params["norm_weight"].reshape(1, C, 1, 1) + params["norm_bias"].reshape(1, C, 1, 1)

    def conv1x1(h, w, b):
        return jnp.einsum("bchw,oc->bohw", h, w.reshape(C, C)) + b.reshape(1, C, 1, 1)

    q = conv1x1(hn, params["q_weight"], params["q_bias"])
    k = conv1x1(hn, params["k_weight"], params["k_bias"])
    v = conv1x1(hn, params["v_weight"], params["v_bias"])
    N = H * W
    q = q.reshape(B, C, N).transpose(0, 2, 1)   # (B, N, C)
    k = k.reshape(B, C, N)                      # (B, C, N)
    w_ = jnp.einsum("bic,bcj->bij", q, k) * (C ** -0.5)
    w_ = jax.nn.softmax(w_, axis=2)
    v = v.reshape(B, C, N)
    h_ = jnp.einsum("bcj,bij->bci", v, w_).reshape(B, C, H, W)
    h_ = conv1x1(h_, params["proj_weight"], params["proj_bias"])
    return x + h_


def make_params(key, C):
    keys = jax.random.split(key, 8)
    scale = 0.1
    return {
        "norm_weight": jnp.ones((C,), jnp.float32),
        "norm_bias": jnp.zeros((C,), jnp.float32),
        "q_weight": scale * jax.random.normal(keys[0], (C, C, 1, 1), jnp.float32),
        "q_bias": scale * jax.random.normal(keys[1], (C,), jnp.float32),
        "k_weight": scale * jax.random.normal(keys[2], (C, C, 1, 1), jnp.float32),
        "k_bias": scale * jax.random.normal(keys[3], (C,), jnp.float32),
        "v_weight": scale * jax.random.normal(keys[4], (C, C, 1, 1), jnp.float32),
        "v_bias": scale * jax.random.normal(keys[5], (C,), jnp.float32),
        "proj_weight": scale * jax.random.normal(keys[6], (C, C, 1, 1), jnp.float32),
        "proj_bias": scale * jax.random.normal(keys[7], (C,), jnp.float32),
    }


if __name__ == "__main__":
    # Small demo shape; in_channels must be divisible by 32 (GroupNorm groups).
    B, C, H, W = 2, 64, 8, 8
    key = jax.random.PRNGKey(0)
    kx, kp = jax.random.split(key)
    x = jax.random.normal(kx, (B, C, H, W), jnp.float32)
    params = make_params(kp, C)

    out = jax.jit(attn_block)(x, params)
    out = jax.block_until_ready(out)

    ref = reference_attn_block(x, params)
    assert out.shape == (B, C, H, W)
    # bf16 MXU inputs with f32 accumulation + approx reciprocal -> loose tol.
    assert np.allclose(np.asarray(out), np.asarray(ref), atol=5e-2, rtol=5e-2)

    print("KERNEL_OK")
</pallas_src>

<mosaic_0001>
module attributes {stable_mosaic.version = 11 : i64} {
  func.func @_gn_stats_kernel(%arg0: i32, %arg1: i32, %arg2: memref<1x64x64xf32, #tpu.memory_space<vmem>>, %arg3: memref<1x64x1xf32, #tpu.memory_space<vmem>>, %arg4: memref<1x64x1xf32, #tpu.memory_space<vmem>>, %arg5: memref<64x64xf32, #tpu.memory_space<vmem>>, %arg6: memref<64x64xf32, #tpu.memory_space<vmem>>) attributes {dimension_semantics = [#tpu.dimension_semantics<parallel>, #tpu.dimension_semantics<arbitrary>], iteration_bounds = array<i64: 2, 1>, scalar_prefetch = 0 : i64, scratch_operands = 2 : i64, tpu.core_type = #tpu.core_type<tc>, window_params = [{transform_indices = @transform_0, window_bounds = array<i64: 1, 64, 64>}, {transform_indices = @transform_1, window_bounds = array<i64: 1, 64, 1>}, {transform_indices = @transform_2, window_bounds = array<i64: 1, 64, 1>}]} {
    %c0_i32 = arith.constant 0 : i32
    %0 = arith.cmpi eq, %arg1, %c0_i32 : i32
    %1 = arith.extui %0 : i1 to i32
    %c0_i32_0 = arith.constant 0 : i32
    %2 = arith.cmpi ne, %1, %c0_i32_0 : i32
    scf.if %2 {
      %cst = arith.constant 0.000000e+00 : f32
      %15 = vector.broadcast %cst : f32 to vector<64x64xf32>
      %c0_13 = arith.constant 0 : index
      %c0_14 = arith.constant 0 : index
      %16 = vector.load %arg5[%c0_13, %c0_14] : memref<64x64xf32, #tpu.memory_space<vmem>>, vector<64x64xf32>
      tpu.vector_store %arg5[%c0_13, %c0_14], %15 {strides = array<i32>} : memref<64x64xf32, #tpu.memory_space<vmem>>, vector<64x64xf32>,
      %cst_15 = arith.constant 0.000000e+00 : f32
      %17 = vector.broadcast %cst_15 : f32 to vector<64x64xf32>
      %c0_16 = arith.constant 0 : index
      %c0_17 = arith.constant 0 : index
      %18 = vector.load %arg6[%c0_16, %c0_17] : memref<64x64xf32, #tpu.memory_space<vmem>>, vector<64x64xf32>
      tpu.vector_store %arg6[%c0_16, %c0_17], %17 {strides = array<i32>} : memref<64x64xf32, #tpu.memory_space<vmem>>, vector<64x64xf32>,
    } else {
    }
    %c0 = arith.constant 0 : index
    %c0_1 = arith.constant 0 : index
    %c0_2 = arith.constant 0 : index
    %3 = vector.load %arg2[%c0, %c0_1, %c0_2] : memref<1x64x64xf32, #tpu.memory_space<vmem>>, vector<1x64x64xf32>
    %4 = vector.shape_cast %3 : vector<1x64x64xf32> to vector<64x64xf32>
    %c0_3 = arith.constant 0 : index
    %c0_4 = arith.constant 0 : index
    %5 = vector.load %arg5[%c0_3, %c0_4] : memref<64x64xf32, #tpu.memory_space<vmem>>, vector<64x64xf32>
    %6 = arith.addf %5, %4 : vector<64x64xf32>
    %c0_5 = arith.constant 0 : index
    %c0_6 = arith.constant 0 : index
    %7 = vector.load %arg5[%c0_5, %c0_6] : memref<64x64xf32, #tpu.memory_space<vmem>>, vector<64x64xf32>
    tpu.vector_store %arg5[%c0_5, %c0_6], %6 {strides = array<i32>} : memref<64x64xf32, #tpu.memory_space<vmem>>, vector<64x64xf32>,
    %c0_7 = arith.constant 0 : index
    %c0_8 = arith.constant 0 : index
    %8 = vector.load %arg6[%c0_7, %c0_8] : memref<64x64xf32, #tpu.memory_space<vmem>>, vector<64x64xf32>
    %9 = arith.mulf %4, %4 : vector<64x64xf32>
    %10 = arith.addf %8, %9 : vector<64x64xf32>
    %c0_9 = arith.constant 0 : index
    %c0_10 = arith.constant 0 : index
    %11 = vector.load %arg6[%c0_9, %c0_10] : memref<64x64xf32, #tpu.memory_space<vmem>>, vector<64x64xf32>
    tpu.vector_store %arg6[%c0_9, %c0_10], %10 {strides = array<i32>} : memref<64x64xf32, #tpu.memory_space<vmem>>, vector<64x64xf32>,
    %c0_i32_11 = arith.constant 0 : i32
    %12 = arith.cmpi eq, %arg1, %c0_i32_11 : i32
    %13 = arith.extui %12 : i1 to i32
    %c0_i32_12 = arith.constant 0 : i32
    %14 = arith.cmpi ne, %13, %c0_i32_12 : i32
    scf.if %14 {
      %c0_13 = arith.constant 0 : index
      %c0_14 = arith.constant 0 : index
      %15 = vector.load %arg5[%c0_13, %c0_14] : memref<64x64xf32, #tpu.memory_space<vmem>>, vector<64x64xf32>
      %cst = arith.constant dense<0.000000e+00> : vector<64xf32>
      %16 = vector.multi_reduction <add>, %15, %cst [1] : vector<64x64xf32> to vector<64xf32>
      %17 = vector.shape_cast %16 : vector<64xf32> to vector<64x1xf32>
      %c0_15 = arith.constant 0 : index
      %c0_16 = arith.constant 0 : index
      %c0_17 = arith.constant 0 : index
      %18 = vector.load %arg3[%c0_15, %c0_16, %c0_17] : memref<1x64x1xf32, #tpu.memory_space<vmem>>, vector<1x64x1xf32>
      %19 = vector.shape_cast %18 : vector<1x64x1xf32> to vector<64x1xf32>
      %20 = vector.shape_cast %17 : vector<64x1xf32> to vector<1x64x1xf32>
      tpu.vector_store %arg3[%c0_15, %c0_16, %c0_17], %20 {strides = array<i32>} : memref<1x64x1xf32, #tpu.memory_space<vmem>>, vector<1x64x1xf32>,
      %c0_18 = arith.constant 0 : index
      %c0_19 = arith.constant 0 : index
      %21 = vector.load %arg6[%c0_18, %c0_19] : memref<64x64xf32, #tpu.memory_space<vmem>>, vector<64x64xf32>
      %cst_20 = arith.constant dense<0.000000e+00> : vector<64xf32>
      %22 = vector.multi_reduction <add>, %21, %cst_20 [1] : vector<64x64xf32> to vector<64xf32>
      %23 = vector.shape_cast %22 : vector<64xf32> to vector<64x1xf32>
      %c0_21 = arith.constant 0 : index
      %c0_22 = arith.constant 0 : index
      %c0_23 = arith.constant 0 : index
      %24 = vector.load %arg4[%c0_21, %c0_22, %c0_23] : memref<1x64x1xf32, #tpu.memory_space<vmem>>, vector<1x64x1xf32>
      %25 = vector.shape_cast %24 : vector<1x64x1xf32> to vector<64x1xf32>
      %26 = vector.shape_cast %23 : vector<64x1xf32> to vector<1x64x1xf32>
      tpu.vector_store %arg4[%c0_21, %c0_22, %c0_23], %26 {strides = array<i32>} : memref<1x64x1xf32, #tpu.memory_space<vmem>>, vector<1x64x1xf32>,
    } else {
    }
    return
  }
  func.func @transform_0(%arg0: i32, %arg1: i32) -> (i32, i32, i32) {
    %c0_i32 = arith.constant 0 : i32
    %c0_i32_0 = arith.constant 0 : i32
    return %arg0, %c0_i32, %arg1 : i32, i32, i32
  }
  func.func @transform_1(%arg0: i32, %arg1: i32) -> (i32, i32, i32) {
    %c0_i32 = arith.constant 0 : i32
    %c0_i32_0 = arith.constant 0 : i32
    %c0_i32_1 = arith.constant 0 : i32
    return %arg0, %c0_i32, %c0_i32_0 : i32, i32, i32
  }
  func.func @transform_2(%arg0: i32, %arg1: i32) -> (i32, i32, i32) {
    %c0_i32 = arith.constant 0 : i32
    %c0_i32_0 = arith.constant 0 : i32
    %c0_i32_1 = arith.constant 0 : i32
    return %arg0, %c0_i32, %c0_i32_0 : i32, i32, i32
  }
}

module attributes {stable_mosaic.version = 11 : i64} {
  func.func @_qkv_proj_kernel(%arg0: i32, %arg1: i32, %arg2: memref<1x64x64xf32, #tpu.memory_space<vmem>>, %arg3: memref<1x64x1xf32, #tpu.memory_space<vmem>>, %arg4: memref<1x64x1xf32, #tpu.memory_space<vmem>>, %arg5: memref<64x64xbf16, #tpu.memory_space<vmem>>, %arg6: memref<1x64xf32, #tpu.memory_space<vmem>>, %arg7: memref<64x64xbf16, #tpu.memory_space<vmem>>, %arg8: memref<64x1xf32, #tpu.memory_space<vmem>>, %arg9: memref<64x64xbf16, #tpu.memory_space<vmem>>, %arg10: memref<1x64xf32, #tpu.memory_space<vmem>>, %arg11: memref<1x64x64xbf16, #tpu.memory_space<vmem>>, %arg12: memref<1x64x64xbf16, #tpu.memory_space<vmem>>, %arg13: memref<1x64x64xbf16, #tpu.memory_space<vmem>>) attributes {dimension_semantics = [#tpu.dimension_semantics<parallel>, #tpu.dimension_semantics<parallel>], iteration_bounds = array<i64: 2, 1>, scalar_prefetch = 0 : i64, scratch_operands = 0 : i64, tpu.core_type = #tpu.core_type<tc>, window_params = [{transform_indices = @transform_0, window_bounds = array<i64: 1, 64, 64>}, {transform_indices = @transform_1, window_bounds = array<i64: 1, 64, 1>}, {transform_indices = @transform_2, window_bounds = array<i64: 1, 64, 1>}, {pipeline_mode = #tpu.pipeline_mode<synchronous>, transform_indices = @transform_3, window_bounds = array<i64: 64, 64>}, {pipeline_mode = #tpu.pipeline_mode<synchronous>, transform_indices = @transform_4, window_bounds = array<i64: 1, 64>}, {pipeline_mode = #tpu.pipeline_mode<synchronous>, transform_indices = @transform_5, window_bounds = array<i64: 64, 64>}, {pipeline_mode = #tpu.pipeline_mode<synchronous>, transform_indices = @transform_6, window_bounds = array<i64: 64, 1>}, {pipeline_mode = #tpu.pipeline_mode<synchronous>, transform_indices = @transform_7, window_bounds = array<i64: 64, 64>}, {pipeline_mode = #tpu.pipeline_mode<synchronous>, transform_indices = @transform_8, window_bounds = array<i64: 1, 64>}, {transform_indices = @transform_9, window_bounds = array<i64: 1, 64, 64>}, {transform_indices = @transform_10, window_bounds = array<i64: 1, 64, 64>}, {transform_indices = @transform_11, window_bounds = array<i64: 1, 64, 64>}]} {
    %c0 = arith.constant 0 : index
    %c0_0 = arith.constant 0 : index
    %c0_1 = arith.constant 0 : index
    %0 = vector.load %arg2[%c0, %c0_0, %c0_1] : memref<1x64x64xf32, #tpu.memory_space<vmem>>, vector<1x64x64xf32>
    %1 = vector.shape_cast %0 : vector<1x64x64xf32> to vector<64x64xf32>
    %c0_2 = arith.constant 0 : index
    %c0_3 = arith.constant 0 : index
    %c0_4 = arith.constant 0 : index
    %2 = vector.load %arg3[%c0_2, %c0_3, %c0_4] : memref<1x64x1xf32, #tpu.memory_space<vmem>>, vector<1x64x1xf32>
    %3 = vector.shape_cast %2 : vector<1x64x1xf32> to vector<64x1xf32>
    %4 = vector.broadcast %3 : vector<64x1xf32> to vector<64x64xf32>
    %5 = arith.mulf %1, %4 : vector<64x64xf32>
    %c0_5 = arith.constant 0 : index
    %c0_6 = arith.constant 0 : index
    %c0_7 = arith.constant 0 : index
    %6 = vector.load %arg4[%c0_5, %c0_6, %c0_7] : memref<1x64x1xf32, #tpu.memory_space<vmem>>, vector<1x64x1xf32>
    %7 = vector.shape_cast %6 : vector<1x64x1xf32> to vector<64x1xf32>
    %8 = vector.broadcast %7 : vector<64x1xf32> to vector<64x64xf32>
    %9 = arith.addf %5, %8 : vector<64x64xf32>
    %10 = arith.truncf %9 : vector<64x64xf32> to vector<64x64xbf16>
    %11 = tpu.transpose %10, [1, 0] : vector<64x64xbf16> -> vector<64x64xbf16>
    %c0_8 = arith.constant 0 : index
    %c0_9 = arith.constant 0 : index
    %12 = vector.load %arg5[%c0_8, %c0_9] : memref<64x64xbf16, #tpu.memory_space<vmem>>, vector<64x64xbf16>
    %cst = arith.constant dense<0.000000e+00> : vector<64x64xf32>
    %13 = tpu.matmul %11, %12, %cst {dimension_numbers = #tpu.dot_dimension_numbers<[1], [0], [0], [1], [0, 0, 1, 1], [], []>} : vector<64x64xbf16>, vector<64x64xbf16>, vector<64x64xf32> -> vector<64x64xf32>
    %c0_10 = arith.constant 0 : index
    %c0_11 = arith.constant 0 : index
    %14 = vector.load %arg6[%c0_10, %c0_11] : memref<1x64xf32, #tpu.memory_space<vmem>>, vector<1x64xf32>
    %15 = vector.broadcast %14 : vector<1x64xf32> to vector<64x64xf32>
    %16 = arith.addf %13, %15 : vector<64x64xf32>
    %c0_12 = arith.constant 0 : index
    %c0_13 = arith.constant 0 : index
    %17 = vector.load %arg9[%c0_12, %c0_13] : memref<64x64xbf16, #tpu.memory_space<vmem>>, vector<64x64xbf16>
    %cst_14 = arith.constant dense<0.000000e+00> : vector<64x64xf32>
    %18 = tpu.matmul %11, %17, %cst_14 {dimension_numbers = #tpu.dot_dimension_numbers<[1], [0], [0], [1], [0, 0, 1, 1], [], []>} : vector<64x64xbf16>, vector<64x64xbf16>, vector<64x64xf32> -> vector<64x64xf32>
    %c0_15 = arith.constant 0 : index
    %c0_16 = arith.constant 0 : index
    %19 = vector.load %arg10[%c0_15, %c0_16] : memref<1x64xf32, #tpu.memory_space<vmem>>, vector<1x64xf32>
    %20 = vector.broadcast %19 : vector<1x64xf32> to vector<64x64xf32>
    %21 = arith.addf %18, %20 : vector<64x64xf32>
    %c0_17 = arith.constant 0 : index
    %c0_18 = arith.constant 0 : index
    %22 = vector.load %arg7[%c0_17, %c0_18] : memref<64x64xbf16, #tpu.memory_space<vmem>>, vector<64x64xbf16>
    %cst_19 = arith.constant dense<0.000000e+00> : vector<64x64xf32>
    %23 = tpu.matmul %22, %10, %cst_19 {dimension_numbers = #tpu.dot_dimension_numbers<[1], [0], [0], [1], [0, 0, 1, 1], [], []>} : vector<64x64xbf16>, vector<64x64xbf16>, vector<64x64xf32> -> vector<64x64xf32>
    %c0_20 = arith.constant 0 : index
    %c0_21 = arith.constant 0 : index
    %24 = vector.load %arg8[%c0_20, %c0_21] : memref<64x1xf32, #tpu.memory_space<vmem>>, vector<64x1xf32>
    %25 = vector.broadcast %24 : vector<64x1xf32> to vector<64x64xf32>
    %26 = arith.addf %23, %25 : vector<64x64xf32>
    %27 = arith.truncf %16 : vector<64x64xf32> to vector<64x64xbf16>
    %c0_22 = arith.constant 0 : index
    %c0_23 = arith.constant 0 : index
    %c0_24 = arith.constant 0 : index
    %28 = vector.load %arg11[%c0_22, %c0_23, %c0_24] : memref<1x64x64xbf16, #tpu.memory_space<vmem>>, vector<1x64x64xbf16>
    %29 = vector.shape_cast %28 : vector<1x64x64xbf16> to vector<64x64xbf16>
    %30 = vector.shape_cast %27 : vector<64x64xbf16> to vector<1x64x64xbf16>
    tpu.vector_store %arg11[%c0_22, %c0_23, %c0_24], %30 {strides = array<i32>} : memref<1x64x64xbf16, #tpu.memory_space<vmem>>, vector<1x64x64xbf16>,
    %31 = arith.truncf %21 : vector<64x64xf32> to vector<64x64xbf16>
    %c0_25 = arith.constant 0 : index
    %c0_26 = arith.constant 0 : index
    %c0_27 = arith.constant 0 : index
    %32 = vector.load %arg13[%c0_25, %c0_26, %c0_27] : memref<1x64x64xbf16, #tpu.memory_space<vmem>>, vector<1x64x64xbf16>
    %33 = vector.shape_cast %32 : vector<1x64x64xbf16> to vector<64x64xbf16>
    %34 = vector.shape_cast %31 : vector<64x64xbf16> to vector<1x64x64xbf16>
    tpu.vector_store %arg13[%c0_25, %c0_26, %c0_27], %34 {strides = array<i32>} : memref<1x64x64xbf16, #tpu.memory_space<vmem>>, vector<1x64x64xbf16>,
    %35 = arith.truncf %26 : vector<64x64xf32> to vector<64x64xbf16>
    %c0_28 = arith.constant 0 : index
    %c0_29 = arith.constant 0 : index
    %c0_30 = arith.constant 0 : index
    %36 = vector.load %arg12[%c0_28, %c0_29, %c0_30] : memref<1x64x64xbf16, #tpu.memory_space<vmem>>, vector<1x64x64xbf16>
    %37 = vector.shape_cast %36 : vector<1x64x64xbf16> to vector<64x64xbf16>
    %38 = vector.shape_cast %35 : vector<64x64xbf16> to vector<1x64x64xbf16>
    tpu.vector_store %arg12[%c0_28, %c0_29, %c0_30], %38 {strides = array<i32>} : memref<1x64x64xbf16, #tpu.memory_space<vmem>>, vector<1x64x64xbf16>,
    return
  }
  func.func @transform_0(%arg0: i32, %arg1: i32) -> (i32, i32, i32) {
    %c0_i32 = arith.constant 0 : i32
    %c0_i32_0 = arith.constant 0 : i32
    return %arg0, %c0_i32, %arg1 : i32, i32, i32
  }
  func.func @transform_1(%arg0: i32, %arg1: i32) -> (i32, i32, i32) {
    %c0_i32 = arith.constant 0 : i32
    %c0_i32_0 = arith.constant 0 : i32
    %c0_i32_1 = arith.constant 0 : i32
    return %arg0, %c0_i32, %c0_i32_0 : i32, i32, i32
  }
  func.func @transform_2(%arg0: i32, %arg1: i32) -> (i32, i32, i32) {
    %c0_i32 = arith.constant 0 : i32
    %c0_i32_0 = arith.constant 0 : i32
    %c0_i32_1 = arith.constant 0 : i32
    return %arg0, %c0_i32, %c0_i32_0 : i32, i32, i32
  }
  func.func @transform_3(%arg0: i32, %arg1: i32) -> (i32, i32) {
    %c0_i32 = arith.constant 0 : i32
    %c0_i32_0 = arith.constant 0 : i32
    %c0_i32_1 = arith.constant 0 : i32
    return %c0_i32, %c0_i32_0 : i32, i32
  }
  func.func @transform_4(%arg0: i32, %arg1: i32) -> (i32, i32) {
    %c0_i32 = arith.constant 0 : i32
    %c0_i32_0 = arith.constant 0 : i32
    %c0_i32_1 = arith.constant 0 : i32
    return %c0_i32, %c0_i32_0 : i32, i32
  }
  func.func @transform_5(%arg0: i32, %arg1: i32) -> (i32, i32) {
    %c0_i32 = arith.constant 0 : i32
    %c0_i32_0 = arith.constant 0 : i32
    %c0_i32_1 = arith.constant 0 : i32
    return %c0_i32, %c0_i32_0 : i32, i32
  }
  func.func @transform_6(%arg0: i32, %arg1: i32) -> (i32, i32) {
    %c0_i32 = arith.constant 0 : i32
    %c0_i32_0 = arith.constant 0 : i32
    %c0_i32_1 = arith.constant 0 : i32
    return %c0_i32, %c0_i32_0 : i32, i32
  }
  func.func @transform_7(%arg0: i32, %arg1: i32) -> (i32, i32) {
    %c0_i32 = arith.constant 0 : i32
    %c0_i32_0 = arith.constant 0 : i32
    %c0_i32_1 = arith.constant 0 : i32
    return %c0_i32, %c0_i32_0 : i32, i32
  }
  func.func @transform_8(%arg0: i32, %arg1: i32) -> (i32, i32) {
    %c0_i32 = arith.constant 0 : i32
    %c0_i32_0 = arith.constant 0 : i32
    %c0_i32_1 = arith.constant 0 : i32
    return %c0_i32, %c0_i32_0 : i32, i32
  }
  func.func @transform_9(%arg0: i32, %arg1: i32) -> (i32, i32, i32) {
    %c0_i32 = arith.constant 0 : i32
    %c0_i32_0 = arith.constant 0 : i32
    return %arg0, %arg1, %c0_i32 : i32, i32, i32
  }
  func.func @transform_10(%arg0: i32, %arg1: i32) -> (i32, i32, i32) {
    %c0_i32 = arith.constant 0 : i32
    %c0_i32_0 = arith.constant 0 : i32
    return %arg0, %c0_i32, %arg1 : i32, i32, i32
  }
  func.func @transform_11(%arg0: i32, %arg1: i32) -> (i32, i32, i32) {
    %c0_i32 = arith.constant 0 : i32
    %c0_i32_0 = arith.constant 0 : i32
    return %arg0, %arg1, %c0_i32 : i32, i32, i32
  }
}

module attributes {stable_mosaic.version = 11 : i64} {
  func.func @_flash_attn_kernel(%arg0: i32, %arg1: i32, %arg2: i32, %arg3: memref<1x64x64xbf16, #tpu.memory_space<vmem>>, %arg4: memref<1x64x64xbf16, #tpu.memory_space<vmem>>, %arg5: memref<1x64x64xbf16, #tpu.memory_space<vmem>>, %arg6: memref<1x64x64xf32, #tpu.memory_space<vmem>>, %arg7: memref<64x64xbf16, #tpu.memory_space<vmem>>, %arg8: memref<1x64xf32, #tpu.memory_space<vmem>>, %arg9: memref<1x64x64xf32, #tpu.memory_space<vmem>>, %arg10: memref<64x1xf32, #tpu.memory_space<vmem>>, %arg11: memref<64x1xf32, #tpu.memory_space<vmem>>, %arg12: memref<64x64xf32, #tpu.memory_space<vmem>>) attributes {dimension_semantics = [#tpu.dimension_semantics<parallel>, #tpu.dimension_semantics<parallel>, #tpu.dimension_semantics<arbitrary>], iteration_bounds = array<i64: 2, 1, 1>, scalar_prefetch = 0 : i64, scratch_operands = 3 : i64, tpu.core_type = #tpu.core_type<tc>, window_params = [{transform_indices = @transform_0, window_bounds = array<i64: 1, 64, 64>}, {transform_indices = @transform_1, window_bounds = array<i64: 1, 64, 64>}, {transform_indices = @transform_2, window_bounds = array<i64: 1, 64, 64>}, {transform_indices = @transform_3, window_bounds = array<i64: 1, 64, 64>}, {pipeline_mode = #tpu.pipeline_mode<synchronous>, transform_indices = @transform_4, window_bounds = array<i64: 64, 64>}, {pipeline_mode = #tpu.pipeline_mode<synchronous>, transform_indices = @transform_5, window_bounds = array<i64: 1, 64>}, {transform_indices = @transform_6, window_bounds = array<i64: 1, 64, 64>}]} {
    %c0_i32 = arith.constant 0 : i32
    %0 = arith.cmpi eq, %arg2, %c0_i32 : i32
    %1 = arith.extui %0 : i1 to i32
    %c0_i32_0 = arith.constant 0 : i32
    %2 = arith.cmpi ne, %1, %c0_i32_0 : i32
    scf.if %2 {
      %cst_26 = arith.constant 0xFF800000 : f32
      %36 = vector.broadcast %cst_26 : f32 to vector<64x1xf32>
      %c0_27 = arith.constant 0 : index
      %c0_28 = arith.constant 0 : index
      %37 = vector.load %arg10[%c0_27, %c0_28] : memref<64x1xf32, #tpu.memory_space<vmem>>, vector<64x1xf32>
      tpu.vector_store %arg10[%c0_27, %c0_28], %36 {strides = array<i32>} : memref<64x1xf32, #tpu.memory_space<vmem>>, vector<64x1xf32>,
      %cst_29 = arith.constant 0.000000e+00 : f32
      %38 = vector.broadcast %cst_29 : f32 to vector<64x1xf32>
      %c0_30 = arith.constant 0 : index
      %c0_31 = arith.constant 0 : index
      %39 = vector.load %arg11[%c0_30, %c0_31] : memref<64x1xf32, #tpu.memory_space<vmem>>, vector<64x1xf32>
      tpu.vector_store %arg11[%c0_30, %c0_31], %38 {strides = array<i32>} : memref<64x1xf32, #tpu.memory_space<vmem>>, vector<64x1xf32>,
      %cst_32 = arith.constant 0.000000e+00 : f32
      %40 = vector.broadcast %cst_32 : f32 to vector<64x64xf32>
      %c0_33 = arith.constant 0 : index
      %c0_34 = arith.constant 0 : index
      %41 = vector.load %arg12[%c0_33, %c0_34] : memref<64x64xf32, #tpu.memory_space<vmem>>, vector<64x64xf32>
      tpu.vector_store %arg12[%c0_33, %c0_34], %40 {strides = array<i32>} : memref<64x64xf32, #tpu.memory_space<vmem>>, vector<64x64xf32>,
    } else {
    }
    %c0 = arith.constant 0 : index
    %c0_1 = arith.constant 0 : index
    %c0_2 = arith.constant 0 : index
    %3 = vector.load %arg3[%c0, %c0_1, %c0_2] : memref<1x64x64xbf16, #tpu.memory_space<vmem>>, vector<1x64x64xbf16>
    %4 = vector.shape_cast %3 : vector<1x64x64xbf16> to vector<64x64xbf16>
    %c0_3 = arith.constant 0 : index
    %c0_4 = arith.constant 0 : index
    %c0_5 = arith.constant 0 : index
    %5 = vector.load %arg4[%c0_3, %c0_4, %c0_5] : memref<1x64x64xbf16, #tpu.memory_space<vmem>>, vector<1x64x64xbf16>
    %6 = vector.shape_cast %5 : vector<1x64x64xbf16> to vector<64x64xbf16>
    %cst = arith.constant dense<0.000000e+00> : vector<64x64xf32>
    %7 = tpu.matmul %4, %6, %cst {dimension_numbers = #tpu.dot_dimension_numbers<[1], [0], [0], [1], [0, 0, 1, 1], [], []>} : vector<64x64xbf16>, vector<64x64xbf16>, vector<64x64xf32> -> vector<64x64xf32>
    %c0_6 = arith.constant 0 : index
    %c0_7 = arith.constant 0 : index
    %8 = vector.load %arg10[%c0_6, %c0_7] : memref<64x1xf32, #tpu.memory_space<vmem>>, vector<64x1xf32>
    %cst_8 = arith.constant dense<0xFF800000> : vector<64xf32>
    %9 = vector.multi_reduction <maximumf>, %7, %cst_8 [1] : vector<64x64xf32> to vector<64xf32>
    %10 = vector.shape_cast %9 : vector<64xf32> to vector<64x1xf32>
    %11 = arith.maximumf %8, %10 : vector<64x1xf32>
    %12 = arith.subf %8, %11 : vector<64x1xf32>
    %13 = math.exp %12 : vector<64x1xf32>
    %14 = vector.broadcast %11 : vector<64x1xf32> to vector<64x64xf32>
    %15 = arith.subf %7, %14 : vector<64x64xf32>
    %16 = math.exp %15 : vector<64x64xf32>
    %c0_9 = arith.constant 0 : index
    %c0_10 = arith.constant 0 : index
    %17 = vector.load %arg11[%c0_9, %c0_10] : memref<64x1xf32, #tpu.memory_space<vmem>>, vector<64x1xf32>
    %18 = arith.mulf %13, %17 : vector<64x1xf32>
    %cst_11 = arith.constant dense<0.000000e+00> : vector<64xf32>
    %19 = vector.multi_reduction <add>, %16, %cst_11 [1] : vector<64x64xf32> to vector<64xf32>
    %20 = vector.shape_cast %19 : vector<64xf32> to vector<64x1xf32>
    %21 = arith.addf %18, %20 : vector<64x1xf32>
    %c0_12 = arith.constant 0 : index
    %c0_13 = arith.constant 0 : index
    %22 = vector.load %arg11[%c0_12, %c0_13] : memref<64x1xf32, #tpu.memory_space<vmem>>, vector<64x1xf32>
    tpu.vector_store %arg11[%c0_12, %c0_13], %21 {strides = array<i32>} : memref<64x1xf32, #tpu.memory_space<vmem>>, vector<64x1xf32>,
    %c0_14 = arith.constant 0 : index
    %c0_15 = arith.constant 0 : index
    %23 = vector.load %arg12[%c0_14, %c0_15] : memref<64x64xf32, #tpu.memory_space<vmem>>, vector<64x64xf32>
    %24 = vector.broadcast %13 : vector<64x1xf32> to vector<64x64xf32>
    %25 = arith.mulf %24, %23 : vector<64x64xf32>
    %26 = arith.truncf %16 : vector<64x64xf32> to vector<64x64xbf16>
    %c0_16 = arith.constant 0 : index
    %c0_17 = arith.constant 0 : index
    %c0_18 = arith.constant 0 : index
    %27 = vector.load %arg5[%c0_16, %c0_17, %c0_18] : memref<1x64x64xbf16, #tpu.memory_space<vmem>>, vector<1x64x64xbf16>
    %28 = vector.shape_cast %27 : vector<1x64x64xbf16> to vector<64x64xbf16>
    %cst_19 = arith.constant dense<0.000000e+00> : vector<64x64xf32>
    %29 = tpu.matmul %26, %28, %cst_19 {dimension_numbers = #tpu.dot_dimension_numbers<[1], [0], [0], [1], [0, 0, 1, 1], [], []>} : vector<64x64xbf16>, vector<64x64xbf16>, vector<64x64xf32> -> vector<64x64xf32>
    %30 = arith.addf %25, %29 : vector<64x64xf32>
    %c0_20 = arith.constant 0 : index
    %c0_21 = arith.constant 0 : index
    %31 = vector.load %arg12[%c0_20, %c0_21] : memref<64x64xf32, #tpu.memory_space<vmem>>, vector<64x64xf32>
    tpu.vector_store %arg12[%c0_20, %c0_21], %30 {strides = array<i32>} : memref<64x64xf32, #tpu.memory_space<vmem>>, vector<64x64xf32>,
    %c0_22 = arith.constant 0 : index
    %c0_23 = arith.constant 0 : index
    %32 = vector.load %arg10[%c0_22, %c0_23] : memref<64x1xf32, #tpu.memory_space<vmem>>, vector<64x1xf32>
    tpu.vector_store %arg10[%c0_22, %c0_23], %11 {strides = array<i32>} : memref<64x1xf32, #tpu.memory_space<vmem>>, vector<64x1xf32>,
    %c0_i32_24 = arith.constant 0 : i32
    %33 = arith.cmpi eq, %arg2, %c0_i32_24 : i32
    %34 = arith.extui %33 : i1 to i32
    %c0_i32_25 = arith.constant 0 : i32
    %35 = arith.cmpi ne, %34, %c0_i32_25 : i32
    scf.if %35 {
      %c0_26 = arith.constant 0 : index
      %c0_27 = arith.constant 0 : index
      %36 = vector.load %arg12[%c0_26, %c0_27] : memref<64x64xf32, #tpu.memory_space<vmem>>, vector<64x64xf32>
      %c0_28 = arith.constant 0 : index
      %c0_29 = arith.constant 0 : index
      %37 = vector.load %arg11[%c0_28, %c0_29] : memref<64x1xf32, #tpu.memory_space<vmem>>, vector<64x1xf32>
      %38 = tpu.reciprocal %37 {approx = true} : vector<64x1xf32> -> vector<64x1xf32>
      %39 = vector.broadcast %38 : vector<64x1xf32> to vector<64x64xf32>
      %40 = arith.mulf %36, %39 : vector<64x64xf32>
      %41 = arith.truncf %40 : vector<64x64xf32> to vector<64x64xbf16>
      %c0_30 = arith.constant 0 : index
      %c0_31 = arith.constant 0 : index
      %42 = vector.load %arg7[%c0_30, %c0_31] : memref<64x64xbf16, #tpu.memory_space<vmem>>, vector<64x64xbf16>
      %cst_32 = arith.constant dense<0.000000e+00> : vector<64x64xf32>
      %43 = tpu.matmul %41, %42, %cst_32 {dimension_numbers = #tpu.dot_dimension_numbers<[1], [0], [0], [1], [0, 0, 1, 1], [], []>} : vector<64x64xbf16>, vector<64x64xbf16>, vector<64x64xf32> -> vector<64x64xf32>
      %c0_33 = arith.constant 0 : index
      %c0_34 = arith.constant 0 : index
      %44 = vector.load %arg8[%c0_33, %c0_34] : memref<1x64xf32, #tpu.memory_space<vmem>>, vector<1x64xf32>
      %45 = vector.broadcast %44 : vector<1x64xf32> to vector<64x64xf32>
      %46 = arith.addf %43, %45 : vector<64x64xf32>
      %c0_35 = arith.constant 0 : index
      %c0_36 = arith.constant 0 : index
      %c0_37 = arith.constant 0 : index
      %47 = vector.load %arg6[%c0_35, %c0_36, %c0_37] : memref<1x64x64xf32, #tpu.memory_space<vmem>>, vector<1x64x64xf32>
      %48 = vector.shape_cast %47 : vector<1x64x64xf32> to vector<64x64xf32>
      %49 = tpu.transpose %46, [1, 0] : vector<64x64xf32> -> vector<64x64xf32>
      %50 = arith.addf %48, %49 : vector<64x64xf32>
      %c0_38 = arith.constant 0 : index
      %c0_39 = arith.constant 0 : index
      %c0_40 = arith.constant 0 : index
      %51 = vector.load %arg9[%c0_38, %c0_39, %c0_40] : memref<1x64x64xf32, #tpu.memory_space<vmem>>, vector<1x64x64xf32>
      %52 = vector.shape_cast %51 : vector<1x64x64xf32> to vector<64x64xf32>
      %53 = vector.shape_cast %50 : vector<64x64xf32> to vector<1x64x64xf32>
      tpu.vector_store %arg9[%c0_38, %c0_39, %c0_40], %53 {strides = array<i32>} : memref<1x64x64xf32, #tpu.memory_space<vmem>>, vector<1x64x64xf32>,
    } else {
    }
    return
  }
  func.func @transform_0(%arg0: i32, %arg1: i32, %arg2: i32) -> (i32, i32, i32) {
    %c0_i32 = arith.constant 0 : i32
    %c0_i32_0 = arith.constant 0 : i32
    return %arg0, %arg1, %c0_i32 : i32, i32, i32
  }
  func.func @transform_1(%arg0: i32, %arg1: i32, %arg2: i32) -> (i32, i32, i32) {
    %c0_i32 = arith.constant 0 : i32
    %c0_i32_0 = arith.constant 0 : i32
    return %arg0, %c0_i32, %arg2 : i32, i32, i32
  }
  func.func @transform_2(%arg0: i32, %arg1: i32, %arg2: i32) -> (i32, i32, i32) {
    %c0_i32 = arith.constant 0 : i32
    %c0_i32_0 = arith.constant 0 : i32
    return %arg0, %arg2, %c0_i32 : i32, i32, i32
  }
  func.func @transform_3(%arg0: i32, %arg1: i32, %arg2: i32) -> (i32, i32, i32) {
    %c0_i32 = arith.constant 0 : i32
    %c0_i32_0 = arith.constant 0 : i32
    return %arg0, %c0_i32, %arg1 : i32, i32, i32
  }
  func.func @transform_4(%arg0: i32, %arg1: i32, %arg2: i32) -> (i32, i32) {
    %c0_i32 = arith.constant 0 : i32
    %c0_i32_0 = arith.constant 0 : i32
    %c0_i32_1 = arith.constant 0 : i32
    return %c0_i32, %c0_i32_0 : i32, i32
  }
  func.func @transform_5(%arg0: i32, %arg1: i32, %arg2: i32) -> (i32, i32) {
    %c0_i32 = arith.constant 0 : i32
    %c0_i32_0 = arith.constant 0 : i32
    %c0_i32_1 = arith.constant 0 : i32
    return %c0_i32, %c0_i32_0 : i32, i32
  }
  func.func @transform_6(%arg0: i32, %arg1: i32, %arg2: i32) -> (i32, i32, i32) {
    %c0_i32 = arith.constant 0 : i32
    %c0_i32_0 = arith.constant 0 : i32
    return %arg0, %c0_i32, %arg1 : i32, i32, i32
  }
}

</mosaic_0001>

<bundles_post_ra>
// kernel: attn_block.3
= control target key start
LH: loop header
LB: loop body
LE: loop exit
PB: predicated region body
PF: predicated region fallthrough
CT: control target
= control target key end

     0   :  { %s533_s9 = smov 0   ;;  %s535_s10 = smov 0   ;;  %s639_s0 = inlined_call_operand.vmem [shape: f32[2,64,64], index: 0, kind: input, shape index: {}]   ;;  %s640_s1 = inlined_call_operand.vmem [shape: f32[2,64,1], index: 1, kind: output, shape index: {0}]   ;;  %s641_s2 = inlined_call_operand.vmem [shape: f32[2,64,1], index: 2, kind: output, shape index: {1}]  }
   0x1   :  { %s537_s11 = smov 0  }
   0x2 LB: > { %s25_s12 = sadd.s32 1, %s511_s10  ;;  %p456_p0 = scmp.ge.s32.totalorder %s515_s11, 1  ;;  %s515_s11 = sphi %s537_s11, %s13_s11   ;;  %s511_s10 = sphi %s535_s10, %s643_s10   ;;  %s507_s9 = sphi %s533_s9, %s642_s9  }
   0x3   : > { %p27_p1 = scmp.ge.s32.totalorder %s25_s12, 2  ;;  %p132_p2 = scmp.lt.s32.totalorder %s515_s11, 3 }
   0x5   : > { %s645_s12 = smov (%p27_p1, %s25_s12), 0  ;;  %p133_p3 = pnand %p456_p0, %p132_p2 }
   0x6   : > { %p162_p4 = scmp.lt.s32.totalorder (!%p133_p3), %s507_s9, 1 }
   0x7   : > { %136 = sbr.rel (%p133_p3) target bundleno = 199 (0xc7), region = 24 }
   0xc   : > { %vm184_vm0 = vcmask 523264   ;;  %v517_v0 = vmov 0.0   ;;  %s647_s9 = smov (!%p162_p4, %s507_s9), 1  ;;  %vm301_vm1 = vcmask 7168  }
   0xd   : > { %187 = vst.msk [vmem:[#allocation2 + $0x10] sm:$0xff] %vm184_vm0, %v517_v0  ;;  %185 = vst.msk [vmem:[#allocation2] sm:$0xff] %vm184_vm0, %v517_v0  ;;  %s568_s13 = sshll.u32 %s647_s9, 6 }
   0xe   : > { %186 = vst.msk [vmem:[#allocation2 + $0x8] sm:$0xff] %vm184_vm0, %v517_v0  ;;  %188 = vst.msk [vmem:[#allocation2 + $0x18] sm:$0xff] %vm184_vm0, %v517_v0  ;;  %s169_s16 = scalar_lea.vmem %s639_s0, %s568_s13  ;;  %s174_s19 = scalar_lea.vmem %s640_s1, %s568_s13 }
   0xf   : > { %189 = vst.msk [vmem:[#allocation2 + $0x20] sm:$0xff] %vm184_vm0, %v517_v0  ;;  %190 = vst.msk [vmem:[#allocation2 + $0x28] sm:$0xff] %vm184_vm0, %v517_v0  ;;  %v203_v1 = vld [vmem:[%s169_s16 + $0x10] sm:$0xff]  ;;  %v201_v2 = vld [vmem:[%s169_s16] sm:$0xff]  ;;  %s179_s22 = scalar_lea.vmem %s641_s2, %s568_s13 }
  0x10   : > { %191 = vst.msk [vmem:[#allocation2 + $0x30] sm:$0xff] %vm184_vm0, %v517_v0  ;;  %192 = vst.msk [vmem:[#allocation2 + $0x38] sm:$0xff] %vm184_vm0, %v517_v0  ;;  %v204_v3 = vld [vmem:[%s169_s16 + $0x18] sm:$0xff]  ;;  %v202_v4 = vld [vmem:[%s169_s16 + $0x8] sm:$0xff]  ;;  %v244_v8 = vmul.f32 %v203_v1, %v203_v1  ;;  %v242_v10 = vmul.f32 %v201_v2, %v201_v2 }
  0x11   : > { %193 = vst.msk [vmem:[#allocation3] sm:$0xff] %vm184_vm0, %v517_v0  ;;  %194 = vst.msk [vmem:[#allocation3 + $0x8] sm:$0xff] %vm184_vm0, %v517_v0  ;;  %v206_v5 = vld [vmem:[%s169_s16 + $0x28] sm:$0xff]  ;;  %v205_v6 = vld [vmem:[%s169_s16 + $0x20] sm:$0xff]  ;;  %v243_v12 = vmul.f32 %v202_v4, %v202_v4  ;;  %v245_v13 = vmul.f32 %v204_v3, %v204_v3 }
  0x12   : > { %195 = vst.msk [vmem:[#allocation3 + $0x10] sm:$0xff] %vm184_vm0, %v517_v0  ;;  %196 = vst.msk [vmem:[#allocation3 + $0x18] sm:$0xff] %vm184_vm0, %v517_v0  ;;  %v247_v20 = vmul.f32 %v206_v5, %v206_v5  ;;  %v208_v24 = vld [vmem:[%s169_s16 + $0x38] sm:$0xff]  ;;  %v207_v26 = vld [vmem:[%s169_s16 + $0x30] sm:$0xff]  ;;  %v246_v27 = vmul.f32 %v205_v6, %v205_v6 }
  0x13   : > { %197 = vst.msk [vmem:[#allocation3 + $0x20] sm:$0xff] %vm184_vm0, %v517_v0  ;;  %198 = vst.msk [vmem:[#allocation3 + $0x28] sm:$0xff] %vm184_vm0, %v517_v0  ;;  %v249_v32 = vmul.f32 %v208_v24, %v208_v24  ;;  %v248_v33 = vmul.f32 %v207_v26, %v207_v26 }
  0x14   : > { %199 = vst.msk [vmem:[#allocation3 + $0x30] sm:$0xff] %vm184_vm0, %v517_v0  ;;  %200 = vst.msk [vmem:[#allocation3 + $0x38] sm:$0xff] %vm184_vm0, %v517_v0  ;;  %v211_v7 = vld [vmem:[#allocation2 + $0x10] sm:$0xff]  ;;  %v209_v9 = vld [vmem:[#allocation2] sm:$0xff] }
  0x15   : > { %v212_v11 = vld [vmem:[#allocation2 + $0x18] sm:$0xff]  ;;  %v219_v14 = vadd.f32 %v211_v7, %v203_v1  ;;  %v217_v15 = vadd.f32 %v209_v9, %v201_v2  ;;  %v210_v17 = vld [vmem:[#allocation2 + $0x8] sm:$0xff] }
  0x16   : > { %v220_v16 = vadd.f32 %v212_v11, %v204_v3  ;;  %v214_v18 = vld [vmem:[#allocation2 + $0x28] sm:$0xff]  ;;  %v213_v19 = vld [vmem:[#allocation2 + $0x20] sm:$0xff]  ;;  %v218_v21 = vadd.f32 %v210_v17, %v202_v4 }
  0x17   : > { %v222_v22 = vadd.f32 %v214_v18, %v206_v5  ;;  %v221_v23 = vadd.f32 %v213_v19, %v205_v6  ;;  %v216_v25 = vld [vmem:[#allocation2 + $0x38] sm:$0xff]  ;;  %228 = vst.msk [vmem:[#allocation2 + $0x10] sm:$0xff] %vm184_vm0, %v219_v14  ;;  %226 = vst.msk [vmem:[#allocation2] sm:$0xff] %vm184_vm0, %v217_v15  ;;  %v215_v29 = vld [vmem:[#allocation2 + $0x30] sm:$0xff] }
  0x18   : > { %229 = vst.msk [vmem:[#allocation2 + $0x18] sm:$0xff] %vm184_vm0, %v220_v16  ;;  %v224_v28 = vadd.f32 %v216_v25, %v208_v24  ;;  %v235_v30 = vld [vmem:[#allocation3 + $0x8] sm:$0xff]  ;;  %v234_v31 = vld [vmem:[#allocation3] sm:$0xff]  ;;  %227 = vst.msk [vmem:[#allocation2 + $0x8] sm:$0xff] %vm184_vm0, %v218_v21  ;;  %v223_v34 = vadd.f32 %v215_v29, %v207_v26 }
  0x19   : > { %231 = vst.msk [vmem:[#allocation2 + $0x28] sm:$0xff] %vm184_vm0, %v222_v22  ;;  %230 = vst.msk [vmem:[#allocation2 + $0x20] sm:$0xff] %vm184_vm0, %v221_v23  ;;  %v251_v35 = vadd.f32 %v243_v12, %v235_v30  ;;  %v250_v36 = vadd.f32 %v242_v10, %v234_v31  ;;  %v237_v37 = vld [vmem:[#allocation3 + $0x18] sm:$0xff]  ;;  %v236_v38 = vld [vmem:[#allocation3 + $0x10] sm:$0xff] }
  0x1a   : > { %v239_v39 = vld [vmem:[#allocation3 + $0x28] sm:$0xff]  ;;  %233 = vst.msk [vmem:[#allocation2 + $0x38] sm:$0xff] %vm184_vm0, %v224_v28  ;;  %v253_v40 = vadd.f32 %v245_v13, %v237_v37  ;;  %v252_v41 = vadd.f32 %v244_v8, %v236_v38  ;;  %v238_v43 = vld [vmem:[#allocation3 + $0x20] sm:$0xff]  ;;  %232 = vst.msk [vmem:[#allocation2 + $0x30] sm:$0xff] %vm184_vm0, %v223_v34 }
  0x1b   : > { %v255_v42 = vadd.f32 %v247_v20, %v239_v39  ;;  %v241_v44 = vld [vmem:[#allocation3 + $0x38] sm:$0xff]  ;;  %v240_v45 = vld [vmem:[#allocation3 + $0x30] sm:$0xff]  ;;  %259 = vst.msk [vmem:[#allocation3 + $0x8] sm:$0xff] %vm184_vm0, %v251_v35  ;;  %258 = vst.msk [vmem:[#allocation3] sm:$0xff] %vm184_vm0, %v250_v36  ;;  %v254_v46 = vadd.f32 %v246_v27, %v238_v43 }
  0x1c   : > { %v257_v47 = vadd.f32 %v249_v32, %v241_v44  ;;  %v256_v48 = vadd.f32 %v248_v33, %v240_v45  ;;  %261 = vst.msk [vmem:[#allocation3 + $0x18] sm:$0xff] %vm184_vm0, %v253_v40  ;;  %260 = vst.msk [vmem:[#allocation3 + $0x10] sm:$0xff] %vm184_vm0, %v252_v41 }
  0x1d   : > { %263 = vst.msk [vmem:[#allocation3 + $0x28] sm:$0xff] %vm184_vm0, %v255_v42  ;;  %262 = vst.msk [vmem:[#allocation3 + $0x20] sm:$0xff] %vm184_vm0, %v254_v46 }
  0x1e   : > { %265 = vst.msk [vmem:[#allocation3 + $0x38] sm:$0xff] %vm184_vm0, %v257_v47  ;;  %264 = vst.msk [vmem:[#allocation3 + $0x30] sm:$0xff] %vm184_vm0, %v256_v48  ;;  %v271_v49 = vld [vmem:[#allocation2 + $0x10] sm:$0xff]  ;;  %v269_v50 = vld [vmem:[#allocation2] sm:$0xff] }
  0x1f   : > { %v272_v51 = vld [vmem:[#allocation2 + $0x18] sm:$0xff]  ;;  %v283_v52 = vsel %vm184_vm0, %v271_v49, 0.0  ;;  %v277_v53 = vsel %vm184_vm0, %v269_v50, 0.0  ;;  %v270_v54 = vld [vmem:[#allocation2 + $0x8] sm:$0xff] }
  0x20   : > { %284 = vadd.xlane.f32.xlu1 %v283_v52  ;;  %278 = vadd.xlane.f32.xlu0 %v277_v53  ;;  %v286_v55 = vsel %vm184_vm0, %v272_v51, 0.0  ;;  %v280_v56 = vsel %vm184_vm0, %v270_v54, 0.0  ;;  %v274_v57 = vld [vmem:[#allocation2 + $0x28] sm:$0xff]  ;;  %v273_v58 = vld [vmem:[#allocation2 + $0x20] sm:$0xff] }
  0x21   : > { %v292_v59 = vsel %vm184_vm0, %v274_v57, 0.0  ;;  %v289_v60 = vsel %vm184_vm0, %v273_v58, 0.0  ;;  %v276_v61 = vld [vmem:[#allocation2 + $0x38] sm:$0xff]  ;;  %v275_v62 = vld [vmem:[#allocation2 + $0x30] sm:$0xff] }
  0x22   : > { %v298_v63 = vsel %vm184_vm0, %v276_v61, 0.0  ;;  %v295_v0 = vsel %vm184_vm0, %v275_v62, 0.0  ;;  %v311_v1 = vld [vmem:[#allocation3 + $0x8] sm:$0xff]  ;;  %v310_v2 = vld [vmem:[#allocation3] sm:$0xff] }
  0x23   : > { %v321_v3 = vsel %vm184_vm0, %v311_v1, 0.0  ;;  %v318_v4 = vsel %vm184_vm0, %v310_v2, 0.0  ;;  %v313_v5 = vld [vmem:[#allocation3 + $0x18] sm:$0xff]  ;;  %v312_v6 = vld [vmem:[#allocation3 + $0x10] sm:$0xff] }
  0x24   : > { %287 = vadd.xlane.f32.xlu1 %v286_v55  ;;  %281 = vadd.xlane.f32.xlu0 %v280_v56  ;;  %v327_v7 = vsel %vm184_vm0, %v313_v5, 0.0  ;;  %v324_v8 = vsel %vm184_vm0, %v312_v6, 0.0  ;;  %v315_v9 = vld [vmem:[#allocation3 + $0x28] sm:$0xff]  ;;  %v314_v10 = vld [vmem:[#allocation3 + $0x20] sm:$0xff] }
  0x25   : > { %v333_v11 = vsel %vm184_vm0, %v315_v9, 0.0  ;;  %v330_v12 = vsel %vm184_vm0, %v314_v10, 0.0  ;;  %v317_v13 = vld [vmem:[#allocation3 + $0x38] sm:$0xff]  ;;  %v316_v14 = vld [vmem:[#allocation3 + $0x30] sm:$0xff] }
  0x26   : > { %v339_v15 = vsel %vm184_vm0, %v317_v13, 0.0  ;;  %v336_v16 = vsel %vm184_vm0, %v316_v14, 0.0 }
  0x28   : > { %293 = vadd.xlane.f32.xlu1 %v292_v59  ;;  %290 = vadd.xlane.f32.xlu0 %v289_v60 }
  0x2c   : > { %299 = vadd.xlane.f32.xlu1 %v298_v63  ;;  %296 = vadd.xlane.f32.xlu0 %v295_v0 }
  0x30   : > { %322 = vadd.xlane.f32.xlu1 %v321_v3  ;;  %319 = vadd.xlane.f32.xlu0 %v318_v4 }
  0x34   : > { %328 = vadd.xlane.f32.xlu1 %v327_v7  ;;  %325 = vadd.xlane.f32.xlu0 %v324_v8 }
  0x38   : > { %334 = vadd.xlane.f32.xlu1 %v333_v11  ;;  %331 = vadd.xlane.f32.xlu0 %v330_v12 }
  0x3c   : > { %340 = vadd.xlane.f32.xlu1 %v339_v15  ;;  %337 = vadd.xlane.f32.xlu0 %v336_v16 }
  0xa9   : > { %v285_v17 = vpop.xlane.xlu1 %284  ;;  %v279_v18 = vpop.xlane.xlu0 %278 }
  0xaa   : > { %304 = vst.msk [vmem:[%s174_s19 + $0x10] sm:$0xff] %vm301_vm1, %v285_v17  ;;  %302 = vst.msk [vmem:[%s174_s19] sm:$0xff] %vm301_vm1, %v279_v18 }
  0xad   : > { %v288_v19 = vpop.xlane.xlu1 %287  ;;  %v282_v20 = vpop.xlane.xlu0 %281 }
  0xae   : > { %305 = vst.msk [vmem:[%s174_s19 + $0x18] sm:$0xff] %vm301_vm1, %v288_v19  ;;  %303 = vst.msk [vmem:[%s174_s19 + $0x8] sm:$0xff] %vm301_vm1, %v282_v20 }
  0xb1   : > { %v294_v21 = vpop.xlane.xlu1 %293  ;;  %v291_v22 = vpop.xlane.xlu0 %290 }
  0xb2   : > { %307 = vst.msk [vmem:[%s174_s19 + $0x28] sm:$0xff] %vm301_vm1, %v294_v21  ;;  %306 = vst.msk [vmem:[%s174_s19 + $0x20] sm:$0xff] %vm301_vm1, %v291_v22 }
  0xb5   : > { %v300_v23 = vpop.xlane.xlu1 %299  ;;  %v297_v24 = vpop.xlane.xlu0 %296 }
  0xb6   : > { %309 = vst.msk [vmem:[%s174_s19 + $0x38] sm:$0xff] %vm301_vm1, %v300_v23  ;;  %308 = vst.msk [vmem:[%s174_s19 + $0x30] sm:$0xff] %vm301_vm1, %v297_v24 }
  0xb9   : > { %v323_v25 = vpop.xlane.xlu1 %322  ;;  %v320_v26 = vpop.xlane.xlu0 %319 }
  0xba   : > { %343 = vst.msk [vmem:[%s179_s22 + $0x8] sm:$0xff] %vm301_vm1, %v323_v25  ;;  %342 = vst.msk [vmem:[%s179_s22] sm:$0xff] %vm301_vm1, %v320_v26 }
  0xbd   : > { %v329_v27 = vpop.xlane.xlu1 %328  ;;  %v326_v28 = vpop.xlane.xlu0 %325 }
  0xbe   : > { %345 = vst.msk [vmem:[%s179_s22 + $0x18] sm:$0xff] %vm301_vm1, %v329_v27  ;;  %344 = vst.msk [vmem:[%s179_s22 + $0x10] sm:$0xff] %vm301_vm1, %v326_v28 }
  0xc1   : > { %v335_v29 = vpop.xlane.xlu1 %334  ;;  %v332_v30 = vpop.xlane.xlu0 %331 }
  0xc2   : > { %347 = vst.msk [vmem:[%s179_s22 + $0x28] sm:$0xff] %vm301_vm1, %v335_v29  ;;  %346 = vst.msk [vmem:[%s179_s22 + $0x20] sm:$0xff] %vm301_vm1, %v332_v30 }
  0xc5   : > { %v341_v31 = vpop.xlane.xlu1 %340  ;;  %v338_v32 = vpop.xlane.xlu0 %337 }
  0xc6   : > { %349 = vst.msk [vmem:[%s179_s22 + $0x38] sm:$0xff] %vm301_vm1, %v341_v31  ;;  %348 = vst.msk [vmem:[%s179_s22 + $0x30] sm:$0xff] %vm301_vm1, %v338_v32 }
  0xc7 PF: > { %s13_s11 = sadd.s32 1, %s515_s11   ;;  %s642_s9 = smov %s511_s10 }
  0xc8   : > { %p10_p5 = scmp.ge.s32.totalorder %s13_s11, 4   ;;  %s643_s10 = smov %s645_s12 }
  0xca   :  { %12 = sbr.rel (!%p10_p5) target bundleno = 2 (0x2), region = 74 }

// kernel: attn_block.4
= control target key start
LH: loop header
LB: loop body
LE: loop exit
PB: predicated region body
PF: predicated region fallthrough
CT: control target
= control target key end

     0   :  { %s1652_s17 = smov 0   ;;  %s1654_s18 = smov 0   ;;  %s1918_s0 = inlined_call_operand.vmem [shape: f32[2,64,64], index: 0, kind: input, shape index: {}]   ;;  %s1919_s1 = inlined_call_operand.vmem [shape: f32[2,64,1], index: 1, kind: input, shape index: {}]   ;;  %s1920_s2 = inlined_call_operand.vmem [shape: f32[2,64,1], index: 2, kind: input, shape index: {}]   ;;  %s1921_s3 = inlined_call_operand.vmem [shape: bf16[64,64], index: 3, kind: input, shape index: {}]   ;;  %s1922_s4 = inlined_call_operand.vmem [shape: f32[1,64], index: 4, kind: input, shape index: {}]   ;;  %s1923_s5 = inlined_call_operand.vmem [shape: bf16[64,64], index: 5, kind: input, shape index: {}]   ;;  %s1924_s6 = inlined_call_operand.vmem [shape: f32[64,1], index: 6, kind: input, shape index: {}]   ;;  %s1925_s7 = inlined_call_operand.vmem [shape: bf16[64,64], index: 7, kind: input, shape index: {}]   ;;  %s1926_s8 = inlined_call_operand.vmem [shape: f32[1,64], index: 8, kind: input, shape index: {}]   ;;  %s1927_s9 = inlined_call_operand.vmem [shape: bf16[2,64,64], index: 9, kind: output, shape index: {0}]   ;;  %s1928_s10 = inlined_call_operand.vmem [shape: bf16[2,64,64], index: 10, kind: output, shape index: {1}]   ;;  %s1929_s11 = inlined_call_operand.vmem [shape: bf16[2,64,64], index: 11, kind: output, shape index: {2}]  }
   0x1   :  { %s1656_s19 = smov 0  }
   0x2 LB: > { %s34_s20 = sadd.s32 1, %s1585_s18  ;;  %p1353_p0 = scmp.ge.s32.totalorder %s1589_s19, 1  ;;  %s1589_s19 = sphi %s1656_s19, %s22_s19   ;;  %s1585_s18 = sphi %s1654_s18, %s1931_s18   ;;  %s1581_s17 = sphi %s1652_s17, %s1930_s17  }
   0x3   : > { %p36_p1 = scmp.ge.s32.totalorder %s34_s20, 2  ;;  %p385_p2 = scmp.lt.s32.totalorder %s1589_s19, 3 }
   0x5   : > { %s1933_s20 = smov (%p36_p1, %s34_s20), 0  ;;  %p386_p3 = pnand %p1353_p0, %p385_p2 }
   0x6   : > { %p459_p4 = scmp.lt.s32.totalorder (!%p386_p3), %s1581_s17, 1 }
   0x7   : > { %389 = sbr.rel (%p386_p3) target bundleno = 485 (0x1e5), region = 56 }
   0xc   : > { %v1591_v0 = vmov 0   ;;  %s1935_s17 = smov (!%p459_p4, %s1581_s17), 1  ;;  %v1555_v9 = vld [vmem:[%s1921_s3 + $0x18] sm:$0xff]   ;;  %v1557_v13 = vld [vmem:[%s1921_s3 + $0x10] sm:$0xff]   ;;  %v1559_v17 = vld [vmem:[%s1921_s3 + $0x8] sm:$0xff]   ;;  %vm685_vm0 = vcmask 523264  }
   0xd   : > { %1554 = vset.pattern.permute.xlu1 %v1591_v0  ;;  %1553 = vset.pattern.permute.xlu0 %v1591_v0  ;;  %s1673_s21 = sshll.u32 %s1935_s17, 6  ;;  %v1556_v10 = vld [vmem:[%s1925_s7 + $0x18] sm:$0xff]   ;;  %v1558_v14 = vld [vmem:[%s1925_s7 + $0x10] sm:$0xff]   ;;  %v1560_v18 = vld [vmem:[%s1925_s7 + $0x8] sm:$0xff]   ;;  %s1815_s14 = sshll.u32 %s1935_s17, 5  ;;  %vm1052_vm1 = vcmask 519168  }
   0xe   : > { %s1679_s24 = scalar_lea.vmem %s1919_s1, %s1673_s21  ;;  %s1689_s27 = scalar_lea.vmem %s1920_s2, %s1673_s21  ;;  %1472 = vmatprep.subr.bf16.mxu0 %v1555_v9  ;;  %1488 = vmatprep.subr.bf16.mxu1 %v1556_v10  ;;  %v1561_v21 = vld [vmem:[%s1921_s3] sm:$0xff]   ;;  %v876_v26 = vld [vmem:[%s1924_s6 + $0x8] sm:$0xff]  ;;  %v877_v27 = vld [vmem:[%s1924_s6 + $0x10] sm:$0xff] }
   0xf   : > { %v516_v1 = vld [vmem:[%s1679_s24 + $0x10] sm:$0xff]  ;;  %v514_v2 = vld [vmem:[%s1679_s24] sm:$0xff]  ;;  %v517_v3 = vld [vmem:[%s1679_s24 + $0x18] sm:$0xff]  ;;  %1473 = vmatpush3.bf16.msra.mxu0 %v1555_v9  ;;  %1489 = vmatpush3.bf16.msra.mxu1 %v1556_v10  ;;  %s1755_s16 = scalar_lea.vmem %s1918_s0, %s1673_s21  ;;  %s1825_s21 = scalar_lea.vmem %s1927_s9, %s1815_s14 }
  0x10   : > { %534 = vperm.xlu1 %1554, %v516_v1   ;;  %524 = vperm.xlu0 %1553, %v514_v2   ;;  %v515_v4 = vld [vmem:[%s1679_s24 + $0x8] sm:$0xff]  ;;  %v570_v6 = vld [vmem:[%s1689_s27] sm:$0xff]  ;;  %v573_v11 = vld [vmem:[%s1689_s27 + $0x18] sm:$0xff]  ;;  %s1882_s26 = scalar_lea.vmem %s1928_s10, %s1815_s14 }
  0x11   : > { %v571_v5 = vld [vmem:[%s1689_s27 + $0x8] sm:$0xff]  ;;  %v518_v8 = vld [vmem:[%s1679_s24 + $0x20] sm:$0xff]  ;;  %v572_v12 = vld [vmem:[%s1689_s27 + $0x10] sm:$0xff]  ;;  %1474 = vmatprep.subr.bf16.mxu0 %v1557_v13  ;;  %1490 = vmatprep.subr.bf16.mxu1 %v1558_v14 }
  0x12   : > { %v519_v7 = vld [vmem:[%s1679_s24 + $0x28] sm:$0xff]  ;;  %v521_v15 = vld [vmem:[%s1679_s24 + $0x38] sm:$0xff]  ;;  %v520_v16 = vld [vmem:[%s1679_s24 + $0x30] sm:$0xff] }
  0x13   : > { %1475 = vmatpush3.bf16.msra.mxu0 %v1557_v13  ;;  %1491 = vmatpush3.bf16.msra.mxu1 %v1558_v14  ;;  %v575_v19 = vld [vmem:[%s1689_s27 + $0x28] sm:$0xff]  ;;  %v574_v20 = vld [vmem:[%s1689_s27 + $0x20] sm:$0xff]  ;;  %v577_v23 = vld [vmem:[%s1689_s27 + $0x38] sm:$0xff] }
  0x14   : > { %539 = vperm.xlu1 %1554, %v517_v3   ;;  %529 = vperm.xlu0 %1553, %v515_v4   ;;  %v1562_v22 = vld [vmem:[%s1925_s7] sm:$0xff]   ;;  %v576_v24 = vld [vmem:[%s1689_s27 + $0x30] sm:$0xff]  ;;  %v878_v28 = vld [vmem:[%s1924_s6 + $0x18] sm:$0xff]  ;;  %s1831_s27 = scalar_lea.vmem %s1929_s11, %s1815_s14 }
  0x15   : > { %1476 = vmatprep.subr.bf16.mxu0 %v1559_v17  ;;  %1492 = vmatprep.subr.bf16.mxu1 %v1560_v18  ;;  %v875_v25 = vld [vmem:[%s1924_s6] sm:$0xff]  ;;  %v880_v30 = vld [vmem:[%s1924_s6 + $0x28] sm:$0xff]  ;;  %v881_v31 = vld [vmem:[%s1924_s6 + $0x30] sm:$0xff] }
  0x16   : > { %v879_v29 = vld [vmem:[%s1924_s6 + $0x20] sm:$0xff]  ;;  %v882_v32 = vld [vmem:[%s1924_s6 + $0x38] sm:$0xff]  ;;  %v507_v38 = vld [vmem:[%s1755_s16 + $0x8] sm:$0xff] }
  0x17   : > { %1477 = vmatpush3.bf16.msra.mxu0 %v1559_v17  ;;  %1493 = vmatpush3.bf16.msra.mxu1 %v1560_v18  ;;  %v506_v35 = vld [vmem:[%s1755_s16] sm:$0xff]  ;;  %v508_v46 = vld [vmem:[%s1755_s16 + $0x10] sm:$0xff]  ;;  %v509_v47 = vld [vmem:[%s1755_s16 + $0x18] sm:$0xff] }
  0x18   : > { %585 = vperm.xlu1 %1554, %v571_v5   ;;  %580 = vperm.xlu0 %1553, %v570_v6   ;;  %v511_v57 = vld [vmem:[%s1755_s16 + $0x28] sm:$0xff]  ;;  %v510_v58 = vld [vmem:[%s1755_s16 + $0x20] sm:$0xff]  ;;  %v513_v63 = vld [vmem:[%s1755_s16 + $0x38] sm:$0xff] }
  0x19   : > { %1478 = vmatprep.subr.bf16.mxu0 %v1561_v21  ;;  %1494 = vmatprep.subr.bf16.mxu1 %v1562_v22  ;;  %v512_v0 = vld [vmem:[%s1755_s16 + $0x30] sm:$0xff]  ;;  %v1563_v17 = vld [vmem:[%s1923_s5] sm:$0xff]  }
  0x1a   : > { %v1564_v18 = vld [vmem:[%s1923_s5 + $0x10] sm:$0xff]  }
  0x1b   : > { %1479 = vmatpush3.bf16.msra.mxu0 %v1561_v21  ;;  %1495 = vmatpush3.bf16.msra.mxu1 %v1562_v22 }
  0x1c   : > { %549 = vperm.xlu1 %1554, %v519_v7   ;;  %544 = vperm.xlu0 %1553, %v518_v8  }
  0x20   : > { %595 = vperm.xlu1 %1554, %v573_v11   ;;  %590 = vperm.xlu0 %1553, %v572_v12  }
  0x24   : > { %559 = vperm.xlu1 %1554, %v521_v15   ;;  %554 = vperm.xlu0 %1553, %v520_v16  }
  0x28   : > { %605 = vperm.xlu1 %1554, %v575_v19   ;;  %600 = vperm.xlu0 %1553, %v574_v20   ;;  %v1565_v19 = vld [vmem:[%s1923_s5 + $0x8] sm:$0xff]   ;;  %v1566_v20 = vld [vmem:[%s1923_s5 + $0x18] sm:$0xff]  }
  0x2c   : > { %615 = vperm.xlu1 %1554, %v577_v23   ;;  %610 = vperm.xlu0 %1553, %v576_v24  }
  0x30   : > { %885 = vperm.xlu1 %1554, %v875_v25   ;;  %v1807_v25 = vld [vmem:[%s1922_s4] ss:$0 sm:$0xff] }
  0x34   : > { %890 = vperm.xlu1 %1554, %v876_v26   ;;  %v1812_v26 = vld [vmem:[%s1926_s8] ss:$0 sm:$0xff] }
  0x38   : > { %895 = vperm.xlu1 %1554, %v877_v27  }
  0x3c   : > { %900 = vperm.xlu1 %1554, %v878_v28  }
  0x40   : > { %905 = vperm.xlu1 %1554, %v879_v29  }
  0x44   : > { %910 = vperm.xlu1 %1554, %v880_v30  }
  0x48   : > { %915 = vperm.xlu1 %1554, %v881_v31  }
  0x4c   : > { %920 = vperm.xlu1 %1554, %v882_v32  }
  0x8b   : > { %v535_v33 = vpop.permute.xlu1 %534  ;;  %v525_v34 = vpop.permute.xlu0 %524 }
  0x8c   : > { %v562_v39 = vmul.f32 %v525_v34, %v506_v35  ;;  %v564_v50 = vmul.f32 %v535_v33, %v508_v46 }
  0x8f   : > { %v540_v36 = vpop.permute.xlu1 %539  ;;  %v530_v37 = vpop.permute.xlu0 %529 }
  0x90   : > { %v563_v40 = vmul.f32 %v530_v37, %v507_v38  ;;  %v565_v51 = vmul.f32 %v540_v36, %v509_v47 }
  0x93   : > { %v586_v41 = vpop.permute.xlu1 %585  ;;  %v581_v42 = vpop.permute.xlu0 %580 }
  0x94   : > { %v619_v43 = vadd.f32 %v586_v41, %v563_v40  ;;  %v618_v44 = vadd.f32 %v581_v42, %v562_v39 }
  0x96   : > { %v1759_v45 = vpack.c.bf16 %v619_v43, %v618_v44 }
  0x97   : > { %v550_v48 = vpop.permute.xlu1 %549  ;;  %v545_v49 = vpop.permute.xlu0 %544 }
  0x98   : > { %630 = vxpose.xlu0.c.b16.start [1/4] (short) (narrow) %v1759_v45, 64  ;;  %v567_v61 = vmul.f32 %v550_v48, %v511_v57  ;;  %v566_v62 = vmul.f32 %v545_v49, %v510_v58 }
  0x9b   : > { %v596_v52 = vpop.permute.xlu1 %595  ;;  %v591_v53 = vpop.permute.xlu0 %590 }
  0x9c   : > { %v621_v54 = vadd.f32 %v596_v52, %v565_v51  ;;  %v620_v55 = vadd.f32 %v591_v53, %v564_v50 }
  0x9e   : > { %v627_v56 = vpack.c.bf16 %v621_v54, %v620_v55 }
  0x9f   : > { %v560_v59 = vpop.permute.xlu1 %559  ;;  %v555_v60 = vpop.permute.xlu0 %554 }
  0xa0   : > { %631 = vxpose.xlu0.c.b16.cont [2/4] (short) (narrow) %v627_v56, 64  ;;  %v569_v5 = vmul.f32 %v560_v59, %v513_v63  ;;  %v568_v6 = vmul.f32 %v555_v60, %v512_v0 }
  0xa3   : > { %v606_v1 = vpop.permute.xlu1 %605  ;;  %v601_v2 = vpop.permute.xlu0 %600 }
  0xa4   : > { %v623_v3 = vadd.f32 %v606_v1, %v567_v61  ;;  %v622_v4 = vadd.f32 %v601_v2, %v566_v62 }
  0xa6   : > { %v628_v7 = vpack.c.bf16 %v623_v3, %v622_v4 }
  0xa7   : > { %v616_v8 = vpop.permute.xlu1 %615  ;;  %v611_v9 = vpop.permute.xlu0 %610 }
  0xa8   : > { %v625_v10 = vadd.f32 %v616_v8, %v569_v5  ;;  %v624_v11 = vadd.f32 %v611_v9, %v568_v6  ;;  %632 = vxpose.xlu0.c.b16.cont [3/4] (short) (narrow) %v628_v7, 64 }
  0xaa   : > { %v629_v12 = vpack.c.bf16 %v625_v10, %v624_v11 }
  0xab   : > { %v1796_v21 = vpop.permute.xlu1 %885 }
  0xac   : > { %1504 = vmatprep.subr.bf16.mxu0 %v629_v12  ;;  %1520 = vmatprep.subr.bf16.mxu1 %v629_v12 }
  0xad   : > { %633 = vxpose.xlu0.c.b16.end [4/4] (short) (narrow) %v629_v12, 64 }
  0xaf   : > { %v1798_v22 = vpop.permute.xlu1 %890 }
  0xb3   : > { %v1800_v23 = vpop.permute.xlu1 %895 }
  0xb7   : > { %v1802_v24 = vpop.permute.xlu1 %900 }
  0xbb   : > { %v1817_v29 = vpop.permute.xlu1 %905 }
  0xbf   : > { %v1841_v46 = vpop.permute.xlu1 %910 }
  0xc3   : > { %v916_v1 = vpop.permute.xlu1 %915 }
 0x103   : > { %v638_v13 = vpop.trf.xlu0 }
 0x104   : > { %1480 = vmatprep.mubr.msk.bf16.mxu0 %vm685_vm0, %v638_v13  ;;  %1496 = vmatprep.mubr.msk.bf16.mxu1 %vm685_vm0, %v638_v13 }
 0x107   : > { %v639_v14 = vpop.trf.xlu0 }
 0x108   : > { %1481 = vmatmul.mubr.msk.bf16.vlgmr.msra.gmra.mxu0 %vm685_vm0, %v639_v14  ;;  %1497 = vmatmul.mubr.msk.bf16.vlgmr.msra.gmra.mxu1 %vm685_vm0, %v639_v14 }
 0x109   : > { %1505 = vmatpush3.bf16.msra.mxu0 %v629_v12  ;;  %1524 = vmatpush3.bf16.msra.mxu1 %v629_v12 }
 0x10a   : > { %1506 = vmatprep.subr.bf16.mxu0 %v628_v7  ;;  %1521 = vmatprep.subr.bf16.mxu1 %v628_v7 }
 0x10b   : > { %v640_v15 = vpop.trf.xlu0 }
 0x10c   : > { %1484 = vmatprep.mubr.msk.bf16.mxu0 %vm685_vm0, %v640_v15  ;;  %1500 = vmatprep.mubr.msk.bf16.mxu1 %vm685_vm0, %v640_v15 }
 0x10d   : > { %1507 = vmatpush3.bf16.msra.mxu0 %v628_v7  ;;  %1525 = vmatpush3.bf16.msra.mxu1 %v628_v7 }
 0x10e   : > { %1508 = vmatprep.subr.bf16.mxu0 %v627_v56  ;;  %1522 = vmatprep.subr.bf16.mxu1 %v627_v56 }
 0x10f   : > { %v641_v16 = vpop.trf.xlu0 }
 0x110   : > { %1485 = vmatmul.mubr.msk.bf16.gmra.mxu0 %vm685_vm0, %v641_v16  ;;  %1501 = vmatmul.mubr.msk.bf16.gmra.mxu1 %vm685_vm0, %v641_v16 }
 0x111   : > { %1509 = vmatpush3.bf16.msra.mxu0 %v627_v56  ;;  %1526 = vmatpush3.bf16.msra.mxu1 %v627_v56 }
 0x112   : > { %1510 = vmatprep.subr.bf16.mxu0 %v1759_v45  ;;  %1523 = vmatprep.subr.bf16.mxu1 %v1759_v45 }
 0x113   : > { %1512 = vmatprep.mubr.msk.bf16.mxu0 %vm685_vm0, %v1563_v17  ;;  %1516 = vmatprep.mubr.msk.bf16.mxu1 %vm685_vm0, %v1564_v18 }
 0x115   : > { %1511 = vmatpush3.bf16.msra.mxu0 %v1759_v45  ;;  %1527 = vmatpush3.bf16.msra.mxu1 %v1759_v45 }
 0x118   : > { %1513 = vmatmul.mubr.msk.bf16.vlgmr.msra.gmra.mxu0 %vm685_vm0, %v1565_v19  ;;  %1517 = vmatmul.mubr.msk.bf16.vlgmr.msra.gmra.mxu1 %vm685_vm0, %v1566_v20  ;;  %v921_v20 = vpop.permute.xlu1 %920 }
 0x1c8   : > { %v1482_v27 = vpop.f32.mrf.mxu0  ;;  %v1498_v28 = vpop.f32.mrf.mxu1 }
 0x1c9   : > { %v741_v30 = vadd.f32 %v1482_v27, %v1807_v25  ;;  %v845_v31 = vadd.f32 %v1498_v28, %v1812_v26 }
 0x1ca   : > { %v732_v32 = vpop.f32.mrf.mxu0  ;;  %v836_v33 = vpop.f32.mrf.mxu1 }
 0x1cb   : > { %v1426_v34 = vpack.c.bf16 %v741_v30, %v741_v30  ;;  %v1434_v35 = vpack.c.bf16 %v845_v31, %v845_v31  ;;  %v733_v36 = vadd.f32 %v1807_v25, %v732_v32  ;;  %v837_v37 = vadd.f32 %v1812_v26, %v836_v33 }
 0x1cc   : > { %v1483_v38 = vpop.f32.mrf.mxu0  ;;  %v1499_v39 = vpop.f32.mrf.mxu1 }
 0x1cd   : > { %1055 = vst.msk [vmem:[%s1825_s21 + $0x8] sm:$0xf] %vm1052_vm1, %v1426_v34  ;;  %1095 = vst.msk [vmem:[%s1831_s27 + $0x8] sm:$0xf] %vm1052_vm1, %v1434_v35  ;;  %v1424_v40 = vpack.c.bf16 %v733_v36, %v733_v36  ;;  %v1432_v41 = vpack.c.bf16 %v837_v37, %v837_v37  ;;  %v744_v42 = vadd.f32 %v1483_v38, %v1807_v25 }
 0x1ce   : > { %v848_v43 = vadd.f32 %v1499_v39, %v1812_v26  ;;  %v735_v44 = vpop.f32.mrf.mxu0  ;;  %v839_v45 = vpop.f32.mrf.mxu1 }
 0x1cf   : > { %1053 = vst.msk [vmem:[%s1825_s21] sm:$0xf] %vm1052_vm1, %v1424_v40  ;;  %1093 = vst.msk [vmem:[%s1831_s27] sm:$0xf] %vm1052_vm1, %v1432_v41  ;;  %v1427_v47 = vpack.c.bf16 %v744_v42, %v744_v42  ;;  %v736_v49 = vadd.f32 %v1807_v25, %v735_v44  ;;  %v840_v50 = vadd.f32 %v1812_v26, %v839_v45 }
 0x1d0   : > { %v1435_v48 = vpack.c.bf16 %v848_v43, %v848_v43  ;;  %v1486_v51 = vpop.f32.mrf.mxu0  ;;  %v1502_v52 = vpop.f32.mrf.mxu1 }
 0x1d1   : > { %1056 = vst.msk [vmem:[%s1825_s21 + $0xc] sm:$0xf] %vm1052_vm1, %v1427_v47  ;;  %v1425_v53 = vpack.c.bf16 %v736_v49, %v736_v49  ;;  %v1433_v54 = vpack.c.bf16 %v840_v50, %v840_v50  ;;  %v757_v55 = vadd.f32 %v1486_v51, %v1807_v25  ;;  %v861_v56 = vadd.f32 %v1502_v52, %v1812_v26 }
 0x1d2   : > { %1096 = vst.msk [vmem:[%s1831_s27 + $0xc] sm:$0xf] %vm1052_vm1, %v1435_v48  ;;  %v748_v57 = vpop.f32.mrf.mxu0  ;;  %v852_v58 = vpop.f32.mrf.mxu1 }
 0x1d3   : > { %1054 = vst.msk [vmem:[%s1825_s21 + $0x4] sm:$0xf] %vm1052_vm1, %v1425_v53  ;;  %1094 = vst.msk [vmem:[%s1831_s27 + $0x4] sm:$0xf] %vm1052_vm1, %v1433_v54  ;;  %v1430_v59 = vpack.c.bf16 %v757_v55, %v757_v55  ;;  %v1438_v60 = vpack.c.bf16 %v861_v56, %v861_v56  ;;  %v749_v61 = vadd.f32 %v1807_v25, %v748_v57 }
 0x1d4   : > { %v853_v62 = vadd.f32 %v1812_v26, %v852_v58  ;;  %v1487_v63 = vpop.f32.mrf.mxu0  ;;  %v1503_v0 = vpop.f32.mrf.mxu1 }
 0x1d5   : > { %1059 = vst.msk [vmem:[%s1825_s21 + $0x18] sm:$0xf] %vm1052_vm1, %v1430_v59  ;;  %1099 = vst.msk [vmem:[%s1831_s27 + $0x18] sm:$0xf] %vm1052_vm1, %v1438_v60  ;;  %v1428_v2 = vpack.c.bf16 %v749_v61, %v749_v61  ;;  %v760_v4 = vadd.f32 %v1487_v63, %v1807_v25  ;;  %v864_v5 = vadd.f32 %v1503_v0, %v1812_v26 }
 0x1d6   : > { %v1436_v3 = vpack.c.bf16 %v853_v62, %v853_v62  ;;  %v751_v6 = vpop.f32.mrf.mxu0  ;;  %v855_v7 = vpop.f32.mrf.mxu1 }
 0x1d7   : > { %1057 = vst.msk [vmem:[%s1825_s21 + $0x10] sm:$0xf] %vm1052_vm1, %v1428_v2  ;;  %v1431_v8 = vpack.c.bf16 %v760_v4, %v760_v4  ;;  %v1439_v9 = vpack.c.bf16 %v864_v5, %v864_v5  ;;  %v752_v10 = vadd.f32 %v1807_v25, %v751_v6  ;;  %v856_v11 = vadd.f32 %v1812_v26, %v855_v7 }
 0x1d8   : > { %1097 = vst.msk [vmem:[%s1831_s27 + $0x10] sm:$0xf] %vm1052_vm1, %v1436_v3  ;;  %v1514_v12 = vpop.f32.mrf.mxu0  ;;  %v1518_v13 = vpop.f32.mrf.mxu1 }
 0x1d9   : > { %1060 = vst.msk [vmem:[%s1825_s21 + $0x1c] sm:$0xf] %vm1052_vm1, %v1431_v8  ;;  %1100 = vst.msk [vmem:[%s1831_s27 + $0x1c] sm:$0xf] %vm1052_vm1, %v1439_v9  ;;  %v1429_v14 = vpack.c.bf16 %v752_v10, %v752_v10  ;;  %v1437_v15 = vpack.c.bf16 %v856_v11, %v856_v11  ;;  %v998_v16 = vadd.f32 %v1514_v12, %v1800_v23 }
 0x1da   : > { %v1014_v17 = vadd.f32 %v1518_v13, %v916_v1  ;;  %v989_v18 = vpop.f32.mrf.mxu0  ;;  %v1005_v19 = vpop.f32.mrf.mxu1 }
 0x1db   : > { %1058 = vst.msk [vmem:[%s1825_s21 + $0x14] sm:$0xf] %vm1052_vm1, %v1429_v14  ;;  %1098 = vst.msk [vmem:[%s1831_s27 + $0x14] sm:$0xf] %vm1052_vm1, %v1437_v15  ;;  %v1442_v25 = vpack.c.bf16 %v998_v16, %v998_v16  ;;  %v990_v23 = vadd.f32 %v989_v18, %v1796_v21  ;;  %v1006_v27 = vadd.f32 %v1005_v19, %v1817_v29 }
 0x1dc   : > { %v1446_v26 = vpack.c.bf16 %v1014_v17, %v1014_v17  ;;  %v1515_v28 = vpop.f32.mrf.mxu0  ;;  %v1519_v30 = vpop.f32.mrf.mxu1 }
 0x1dd   : > { %1135 = vst.msk [vmem:[%s1882_s26 + $0x8] sm:$0xf] %vm1052_vm1, %v1442_v25  ;;  %v1440_v31 = vpack.c.bf16 %v990_v23, %v990_v23  ;;  %v1444_v32 = vpack.c.bf16 %v1006_v27, %v1006_v27  ;;  %v1001_v33 = vadd.f32 %v1515_v28, %v1802_v24  ;;  %v1017_v34 = vadd.f32 %v1519_v30, %v921_v20 }
 0x1de   : > { %1139 = vst.msk [vmem:[%s1882_s26 + $0x18] sm:$0xf] %vm1052_vm1, %v1446_v26  ;;  %v992_v35 = vpop.f32.mrf.mxu0  ;;  %v1008_v36 = vpop.f32.mrf.mxu1 }
 0x1df   : > { %1133 = vst.msk [vmem:[%s1882_s26] sm:$0xf] %vm1052_vm1, %v1440_v31  ;;  %1137 = vst.msk [vmem:[%s1882_s26 + $0x10] sm:$0xf] %vm1052_vm1, %v1444_v32  ;;  %v1443_v21 = vpack.c.bf16 %v1001_v33, %v1001_v33  ;;  %v1447_v29 = vpack.c.bf16 %v1017_v34, %v1017_v34  ;;  %v993_v37 = vadd.f32 %v992_v35, %v1798_v22 }
 0x1e0   : > { %v1009_v38 = vadd.f32 %v1008_v36, %v1841_v46 }
 0x1e1   : > { %1136 = vst.msk [vmem:[%s1882_s26 + $0xc] sm:$0xf] %vm1052_vm1, %v1443_v21  ;;  %1140 = vst.msk [vmem:[%s1882_s26 + $0x1c] sm:$0xf] %vm1052_vm1, %v1447_v29  ;;  %v1441_v39 = vpack.c.bf16 %v993_v37, %v993_v37 }
 0x1e2   : > { %v1445_v40 = vpack.c.bf16 %v1009_v38, %v1009_v38 }
 0x1e3   : > { %1134 = vst.msk [vmem:[%s1882_s26 + $0x4] sm:$0xf] %vm1052_vm1, %v1441_v39 }
 0x1e4   : > { %1138 = vst.msk [vmem:[%s1882_s26 + $0x14] sm:$0xf] %vm1052_vm1, %v1445_v40 }
 0x1e5 PF: > { %s22_s19 = sadd.s32 1, %s1589_s19   ;;  %s1930_s17 = smov %s1585_s18 }
 0x1e6   : > { %p19_p5 = scmp.ge.s32.totalorder %s22_s19, 4   ;;  %s1931_s18 = smov %s1933_s20 }
 0x1e8   :  { %21 = sbr.rel (!%p19_p5) target bundleno = 2 (0x2), region = 116 }

// kernel: attn_block.5
= control target key start
LH: loop header
LB: loop body
LE: loop exit
PB: predicated region body
PF: predicated region fallthrough
CT: control target
= control target key end

     0   :  { %s1617_s21 = smov 0   ;;  %s1619_s22 = smov 0   ;;  %s1905_s0 = inlined_call_operand.vmem [shape: bf16[2,64,64], index: 0, kind: input, shape index: {}]   ;;  %s1906_s1 = inlined_call_operand.vmem [shape: bf16[2,64,64], index: 1, kind: input, shape index: {}]   ;;  %s1907_s2 = inlined_call_operand.vmem [shape: bf16[2,64,64], index: 2, kind: input, shape index: {}]   ;;  %s1908_s3 = inlined_call_operand.vmem [shape: f32[2,64,64], index: 3, kind: input, shape index: {}]   ;;  %s1909_s4 = inlined_call_operand.vmem [shape: bf16[64,64], index: 4, kind: input, shape index: {}]   ;;  %s1910_s5 = inlined_call_operand.vmem [shape: f32[1,64], index: 5, kind: input, shape index: {}]   ;;  %s1911_s6 = inlined_call_operand.vmem [shape: f32[2,64,64], index: 6, kind: output, shape index: {}]  }
   0x1   :  { %s1621_s23 = smov 0  }
   0x2 LB: > { %s35_s24 = sadd.s32 1, %s1573_s22  ;;  %p1335_p0 = scmp.ge.s32.totalorder %s1577_s23, 1  ;;  %s1577_s23 = sphi %s1621_s23, %s16_s23   ;;  %s1573_s22 = sphi %s1619_s22, %s1913_s22   ;;  %s1569_s21 = sphi %s1617_s21, %s1912_s21  }
   0x3   : > { %p37_p1 = scmp.ge.s32.totalorder %s35_s24, 2  ;;  %p287_p2 = scmp.lt.s32.totalorder %s1577_s23, 3 }
   0x5   : > { %s1915_s24 = smov (%p37_p1, %s35_s24), 0  ;;  %p288_p3 = pnand %p1335_p0, %p287_p2 }
   0x6   : > { %p350_p4 = scmp.lt.s32.totalorder (!%p288_p3), %s1569_s21, 1 }
   0x7   : > { %291 = sbr.rel (%p288_p3) target bundleno = 1164 (0x48c), region = 44 }
   0xc   : > { %s1917_s21 = smov (!%p350_p4, %s1569_s21), 1  ;;  %vm415_vm0 = vcmask 523264   ;;  %vm398_vm1 = vcmask 7168   ;;  %v1579_v8 = vmov -inf   ;;  %v1580_v21 = vmov 0  }
   0xd   : > { %s1638_s25 = sshll.u32 %s1917_s21, 5  ;;  %401 = vst.msk [vmem:[#allocation2 + $0x10] sm:$0xff] %vm398_vm1, %v1579_v8  ;;  %399 = vst.msk [vmem:[#allocation2] sm:$0xff] %vm398_vm1, %v1579_v8  ;;  %1490 = vset.pattern.permute.xlu1 %v1580_v21  ;;  %1489 = vset.pattern.permute.xlu0 %v1580_v21  ;;  %v1581_v26 = vmov 0.0  }
   0xe   : > { %s366_s28 = scalar_lea.vmem %s1906_s1, %s1638_s25  ;;  %s357_s7 = scalar_lea.vmem %s1905_s0, %s1638_s25  ;;  %400 = vst.msk [vmem:[#allocation2 + $0x8] sm:$0xff] %vm398_vm1, %v1579_v8  ;;  %402 = vst.msk [vmem:[#allocation2 + $0x18] sm:$0xff] %vm398_vm1, %v1579_v8 }
   0xf   : > { %v1491_v0 = vld [vmem:[%s366_s28 + $0x18] sm:$0xff]   ;;  %v1492_v1 = vld [vmem:[%s366_s28 + $0x10] sm:$0xff]   ;;  %v1493_v2 = vld [vmem:[%s366_s28 + $0x8] sm:$0xff]   ;;  %403 = vst.msk [vmem:[#allocation2 + $0x20] sm:$0xff] %vm398_vm1, %v1579_v8  ;;  %s375_s10 = scalar_lea.vmem %s1907_s2, %s1638_s25  ;;  %s1380_s25 = sshll.u32 %s1917_s21, 6 }
  0x10   : > { %1406 = vmatprep.subr.bf16.mxu0 %v1491_v0  ;;  %v1495_v3 = vld [vmem:[%s357_s7] sm:$0xff]   ;;  %v1496_v5 = vld [vmem:[%s357_s7 + $0x8] sm:$0xff]   ;;  %v1497_v6 = vld [vmem:[%s357_s7 + $0x10] sm:$0xff]   ;;  %404 = vst.msk [vmem:[#allocation2 + $0x28] sm:$0xff] %vm398_vm1, %v1579_v8 }
  0x11   : > { %1407 = vmatpush3.bf16.msra.mxu0 %v1491_v0  ;;  %1414 = vmatprep.mubr.msk.bf16.mxu0 %vm415_vm0, %v1495_v3  ;;  %v1494_v4 = vld [vmem:[%s366_s28] sm:$0xff]   ;;  %v1498_v7 = vld [vmem:[%s357_s7 + $0x18] sm:$0xff]   ;;  %405 = vst.msk [vmem:[#allocation2 + $0x30] sm:$0xff] %vm398_vm1, %v1579_v8  ;;  %406 = vst.msk [vmem:[#allocation2 + $0x38] sm:$0xff] %vm398_vm1, %v1579_v8  ;;  %s384_s28 = scalar_lea.vmem %s1908_s3, %s1380_s25  ;;  %s1878_s7 = scalar_lea.vmem %s1911_s6, %s1380_s25 }
  0x12   : > { %1408 = vmatprep.subr.bf16.mxu0 %v1492_v1  ;;  %407 = vst.msk [vmem:[#allocation3] sm:$0xff] %vm398_vm1, %v1581_v26  ;;  %408 = vst.msk [vmem:[#allocation3 + $0x8] sm:$0xff] %vm398_vm1, %v1581_v26  ;;  %v1499_v48 = vld [vmem:[%s375_s10 + $0x18] sm:$0xff]   ;;  %v1500_v54 = vld [vmem:[%s375_s10 + $0x10] sm:$0xff]  }
  0x13   : > { %409 = vst.msk [vmem:[#allocation3 + $0x10] sm:$0xff] %vm398_vm1, %v1581_v26  ;;  %410 = vst.msk [vmem:[#allocation3 + $0x18] sm:$0xff] %vm398_vm1, %v1581_v26  ;;  %1422 = vmatprep.subr.bf16.mxu1 %v1499_v48  ;;  %v1501_v60 = vld [vmem:[%s375_s10 + $0x8] sm:$0xff]   ;;  %v1502_v62 = vld [vmem:[%s375_s10] sm:$0xff]  }
  0x14   : > { %411 = vst.msk [vmem:[#allocation3 + $0x20] sm:$0xff] %vm398_vm1, %v1581_v26  ;;  %412 = vst.msk [vmem:[#allocation3 + $0x28] sm:$0xff] %vm398_vm1, %v1581_v26  ;;  %v1708_v27 = vld [vmem:[#allocation2 + $0x10] sm:$0xff]  ;;  %v1710_v29 = vld [vmem:[#allocation2] sm:$0xff]  ;;  %1423 = vmatpush3.bf16.msra.mxu1 %v1499_v48 }
  0x15   : > { %1409 = vmatpush3.bf16.msra.mxu0 %v1492_v1  ;;  %413 = vst.msk [vmem:[#allocation3 + $0x30] sm:$0xff] %vm398_vm1, %v1581_v26  ;;  %414 = vst.msk [vmem:[#allocation3 + $0x38] sm:$0xff] %vm398_vm1, %v1581_v26  ;;  %v1715_v32 = vld [vmem:[#allocation2 + $0x18] sm:$0xff]  ;;  %v1725_v36 = vld [vmem:[#allocation2 + $0x8] sm:$0xff]  ;;  %1424 = vmatprep.subr.bf16.mxu1 %v1500_v54 }
  0x16   : > { %1410 = vmatprep.subr.bf16.mxu0 %v1493_v2  ;;  %416 = vst.msk [vmem:[#allocation4] sm:$0xff] %vm415_vm0, %v1581_v26  ;;  %417 = vst.msk [vmem:[#allocation4 + $0x8] sm:$0xff] %vm415_vm0, %v1581_v26  ;;  %v1743_v42 = vld [vmem:[#allocation2 + $0x20] sm:$0xff] }
  0x17   : > { %418 = vst.msk [vmem:[#allocation4 + $0x10] sm:$0xff] %vm415_vm0, %v1581_v26  ;;  %419 = vst.msk [vmem:[#allocation4 + $0x18] sm:$0xff] %vm415_vm0, %v1581_v26  ;;  %v1759_v47 = vld [vmem:[#allocation2 + $0x28] sm:$0xff] }
  0x18   : > { %420 = vst.msk [vmem:[#allocation4 + $0x20] sm:$0xff] %vm415_vm0, %v1581_v26  ;;  %421 = vst.msk [vmem:[#allocation4 + $0x28] sm:$0xff] %vm415_vm0, %v1581_v26  ;;  %v1749_v45 = vld [vmem:[#allocation2 + $0x30] sm:$0xff]  ;;  %v1771_v55 = vld [vmem:[#allocation2 + $0x38] sm:$0xff]  ;;  %1425 = vmatpush3.bf16.msra.mxu1 %v1500_v54 }
  0x19   : > { %1411 = vmatpush3.bf16.msra.mxu0 %v1493_v2  ;;  %422 = vst.msk [vmem:[#allocation4 + $0x30] sm:$0xff] %vm415_vm0, %v1581_v26  ;;  %423 = vst.msk [vmem:[#allocation4 + $0x38] sm:$0xff] %vm415_vm0, %v1581_v26  ;;  %1426 = vmatprep.subr.bf16.mxu1 %v1501_v60 }
  0x1a   : > { %1412 = vmatprep.subr.bf16.mxu0 %v1494_v4 }
  0x1c   : > { %1427 = vmatpush3.bf16.msra.mxu1 %v1501_v60 }
  0x1d   : > { %1413 = vmatpush3.bf16.msra.mxu0 %v1494_v4  ;;  %1428 = vmatprep.subr.bf16.mxu1 %v1502_v62 }
  0x20   : > { %1415 = vmatmul.mubr.msk.bf16.vlgmr.msra.gmra.mxu0 %vm415_vm0, %v1496_v5  ;;  %1429 = vmatpush3.bf16.msra.mxu1 %v1502_v62 }
  0x21   : > { %1418 = vmatprep.mubr.msk.bf16.mxu0 %vm415_vm0, %v1497_v6 }
  0x28   : > { %1419 = vmatmul.mubr.msk.bf16.gmra.mxu0 %vm415_vm0, %v1498_v7 }
  0xe0   : > { %v1660_v9 = vpop.f32.mrf.mxu0 }
  0xe1   : > { %v576_v10 = vsel %vm415_vm0, %v1660_v9, -inf }
  0xe2   : > { %577 = vmax.xlane.f32.xlu1 %v576_v10  ;;  %v1664_v11 = vpop.f32.mrf.mxu0 }
  0xe3   : > { %v570_v12 = vsel %vm415_vm0, %v1664_v11, -inf }
  0xe4   : > { %571 = vmax.xlane.f32.xlu0 %v570_v12  ;;  %v1668_v13 = vpop.f32.mrf.mxu0 }
  0xe5   : > { %v579_v14 = vsel %vm415_vm0, %v1668_v13, -inf }
  0xe6   : > { %580 = vmax.xlane.f32.xlu1 %v579_v14  ;;  %v1672_v15 = vpop.f32.mrf.mxu0 }
  0xe7   : > { %v573_v16 = vsel %vm415_vm0, %v1672_v15, -inf }
  0xe8   : > { %574 = vmax.xlane.f32.xlu0 %v573_v16  ;;  %v1676_v17 = vpop.f32.mrf.mxu0 }
  0xe9   : > { %v588_v23 = vsel %vm415_vm0, %v1676_v17, -inf }
  0xea   : > { %v1678_v18 = vpop.f32.mrf.mxu0 }
  0xeb   : > { %v582_v19 = vsel %vm415_vm0, %v1678_v18, -inf }
  0xec   : > { %583 = vmax.xlane.f32.xlu0 %v582_v19  ;;  %v1682_v20 = vpop.f32.mrf.mxu0 }
  0xed   : > { %v591_v25 = vsel %vm415_vm0, %v1682_v20, -inf }
  0xee   : > { %v1684_v22 = vpop.f32.mrf.mxu0 }
  0xef   : > { %v585_v24 = vsel %vm415_vm0, %v1684_v22, -inf }
  0xf0   : > { %589 = vmax.xlane.f32.xlu0 %v588_v23  ;;  %586 = vmax.xlane.f32.xlu1 %v585_v24 }
  0xf4   : > { %592 = vmax.xlane.f32.xlu1 %v591_v25 }
 0x16b   : > { %v578_v28 = vpop.xlane.xlu1 %577 }
 0x16c   : > { %v1713_v30 = vmax.f32 %v1708_v27, %v578_v28 }
 0x16d   : > { %v572_v31 = vpop.xlane.xlu0 %571 }
 0x16e   : > { %v604_v33 = vsub.f32 %v1708_v27, %v1713_v30  ;;  %934 = vst.msk [vmem:[#allocation2 + $0x10] sm:$0xff] %vm398_vm1, %v1713_v30  ;;  %v1722_v34 = vmax.f32 %v1710_v29, %v572_v31  ;;  %638 = vperm.xlu1 %1490, %v1713_v30  }
 0x16f   : > { %v581_v35 = vpop.xlane.xlu1 %580 }
 0x170   : > { %v602_v37 = vsub.f32 %v1710_v29, %v1722_v34  ;;  %932 = vst.msk [vmem:[#allocation2] sm:$0xff] %vm398_vm1, %v1722_v34  ;;  %v1732_v38 = vmax.f32 %v1715_v32, %v581_v35  ;;  %628 = vperm.xlu0 %1489, %v1722_v34  }
 0x171   : > { %v575_v39 = vpop.xlane.xlu0 %574 }
 0x172   : > { %v605_v40 = vsub.f32 %v1715_v32, %v1732_v38  ;;  %935 = vst.msk [vmem:[#allocation2 + $0x18] sm:$0xff] %vm398_vm1, %v1732_v38  ;;  %v1740_v41 = vmax.f32 %v1725_v36, %v575_v39  ;;  %643 = vperm.xlu1 %1490, %v1732_v38  }
 0x174   : > { %v603_v43 = vsub.f32 %v1725_v36, %v1740_v41  ;;  %933 = vst.msk [vmem:[#allocation2 + $0x8] sm:$0xff] %vm398_vm1, %v1740_v41  ;;  %v616_v36 = vmul.f32 1.442695, %v605_v40 }
 0x175   : > { %v584_v44 = vpop.xlane.xlu0 %583 }
 0x176   : > { %v1756_v46 = vmax.f32 %v1743_v42, %v584_v44  ;;  %633 = vperm.xlu1 %1490, %v1740_v41  }
 0x178   : > { %v606_v49 = vsub.f32 %v1743_v42, %v1756_v46  ;;  %936 = vst.msk [vmem:[#allocation2 + $0x20] sm:$0xff] %vm398_vm1, %v1756_v46 }
 0x179   : > { %v590_v50 = vpop.xlane.xlu0 %589  ;;  %v587_v51 = vpop.xlane.xlu1 %586 }
 0x17a   : > { %v1766_v52 = vmax.f32 %v1749_v45, %v590_v50  ;;  %v1769_v53 = vmax.f32 %v1759_v47, %v587_v51  ;;  %v618_v41 = vmul.f32 1.442695, %v606_v49 }
 0x17c   : > { %v608_v56 = vsub.f32 %v1749_v45, %v1766_v52  ;;  %938 = vst.msk [vmem:[#allocation2 + $0x30] sm:$0xff] %vm398_vm1, %v1766_v52  ;;  %v607_v57 = vsub.f32 %v1759_v47, %v1769_v53  ;;  %937 = vst.msk [vmem:[#allocation2 + $0x28] sm:$0xff] %vm398_vm1, %v1769_v53  ;;  %658 = vperm.xlu1 %1490, %v1766_v52   ;;  %v1503_v45 = vld [vmem:[%s1909_s4 + $0x18] sm:$0xff]  }
 0x17d   : > { %v593_v58 = vpop.xlane.xlu1 %592  ;;  %1438 = vmatprep.subr.bf16.mxu0 %v1503_v45  ;;  %1454 = vmatprep.subr.bf16.mxu1 %v1503_v45  ;;  %v693_v52 = vld [vmem:[#allocation3 + $0x18] sm:$0xff] }
 0x17e   : > { %v1783_v59 = vmax.f32 %v1771_v55, %v593_v58  ;;  %v620_v29 = vmul.f32 1.442695, %v607_v57  ;;  %v622_v27 = vmul.f32 1.442695, %v608_v56  ;;  %1439 = vmatpush3.bf16.msra.mxu0 %v1503_v45 }
 0x180   : > { %v609_v61 = vsub.f32 %v1771_v55, %v1783_v59  ;;  %939 = vst.msk [vmem:[#allocation2 + $0x38] sm:$0xff] %vm398_vm1, %v1783_v59  ;;  %648 = vperm.xlu1 %1490, %v1756_v46   ;;  %v690_v46 = vld [vmem:[#allocation3] sm:$0xff]  ;;  %v691_v55 = vld [vmem:[#allocation3 + $0x8] sm:$0xff] }
 0x182   : > { %v624_v30 = vmul.f32 1.442695, %v609_v61 }
 0x184   : > { %653 = vperm.xlu1 %1490, %v1769_v53  }
 0x188   : > { %663 = vperm.xlu1 %1490, %v1783_v59  }
 0x1e9   : > { %v639_v63 = vpop.permute.xlu1 %638 }
 0x1ea   : > { %v668_v5 = vsub.f32 %v1660_v9, %v639_v63 }
 0x1eb   : > { %v629_v0 = vpop.permute.xlu0 %628 }
 0x1ec   : > { %v666_v1 = vsub.f32 %v1664_v11, %v629_v0  ;;  %v678_v10 = vmul.f32 1.442695, %v668_v5  ;;  %v614_v5 = vmul.f32 1.442695, %v604_v33 }
 0x1ed   : > { %v644_v2 = vpop.permute.xlu1 %643 }
 0x1ee   : > { %v674_v3 = vmul.f32 1.442695, %v666_v1  ;;  %v669_v4 = vsub.f32 %v1668_v13, %v644_v2  ;;  %v612_v1 = vmul.f32 1.442695, %v603_v43 }
 0x1f0   : > { %1507 = vpow2.f32 %v674_v3  ;;  %v680_v6 = vmul.f32 1.442695, %v669_v4  ;;  %v610_v4 = vmul.f32 1.442695, %v602_v37 }
 0x1f1   : > { %v634_v7 = vpop.permute.xlu1 %633 }
 0x1f2   : > { %1509 = vpow2.f32 %v680_v6  ;;  %v667_v8 = vsub.f32 %v1672_v15, %v634_v7  ;;  %v692_v7 = vld [vmem:[#allocation3 + $0x10] sm:$0xff] }
 0x1f4   : > { %v676_v12 = vmul.f32 1.442695, %v667_v8 }
 0x1f6   : > { %1511 = vpow2.f32 %v676_v12 }
 0x1f7   : > { %1513 = vpow2.f32 %v678_v10  ;;  %v659_v14 = vpop.permute.xlu1 %658 }
 0x1f8   : > { %v672_v16 = vsub.f32 %v1676_v17, %v659_v14 }
 0x1fa   : > { %v686_v13 = vmul.f32 1.442695, %v672_v16 }
 0x1fb   : > { %v649_v11 = vpop.permute.xlu1 %648 }
 0x1fc   : > { %v670_v19 = vsub.f32 %v1678_v18, %v649_v11  ;;  %v694_v11 = vld [vmem:[#allocation3 + $0x20] sm:$0xff] }
 0x1fd   : > { %v1508_v21 = vpop.eup %1507 }
 0x1fe   : > { %v682_v23 = vmul.f32 1.442695, %v670_v19  ;;  %v706_v9 = vsel %vm415_vm0, %v1508_v21, 0.0 }
 0x1ff   : > { %v1510_v24 = vpop.eup %1509  ;;  %707 = vadd.xlane.f32.xlu1 %v706_v9  ;;  %v654_v25 = vpop.permute.xlu1 %653 }
 0x200   : > { %1515 = vpow2.f32 %v682_v23  ;;  %v671_v15 = vsub.f32 %v1684_v22, %v654_v25  ;;  %v715_v28 = vsel %vm415_vm0, %v1510_v24, 0.0  ;;  %v695_v23 = vld [vmem:[#allocation3 + $0x28] sm:$0xff] }
 0x201   : > { %1517 = vpow2.f32 %v686_v13  ;;  %v696_v13 = vld [vmem:[#allocation3 + $0x30] sm:$0xff] }
 0x202   : > { %v684_v26 = vmul.f32 1.442695, %v671_v15 }
 0x203   : > { %v1512_v31 = vpop.eup %1511  ;;  %716 = vadd.xlane.f32.xlu1 %v715_v28  ;;  %v664_v17 = vpop.permute.xlu1 %663 }
 0x204   : > { %v1514_v35 = vpop.eup %1513  ;;  %1519 = vpow2.f32 %v684_v26  ;;  %v673_v18 = vsub.f32 %v1682_v20, %v664_v17  ;;  %v709_v39 = vsel %vm415_vm0, %v1512_v31, 0.0  ;;  %v803_v44 = vpack.c.bf16 %v1512_v31, %v1508_v21  ;;  %v697_v17 = vld [vmem:[#allocation3 + $0x38] sm:$0xff] }
 0x205   : > { %710 = vadd.xlane.f32.xlu0 %v709_v39  ;;  %v804_v48 = vpack.c.bf16 %v1510_v24, %v1514_v35  ;;  %v712_v22 = vsel %vm415_vm0, %v1514_v35, 0.0 }
 0x206   : > { %v688_v50 = vmul.f32 1.442695, %v673_v18  ;;  %1430 = vmatprep.mubr.msk.bf16.mxu1 %vm415_vm0, %v803_v44  ;;  %v1504_v44 = vld [vmem:[%s1909_s4 + $0x10] sm:$0xff]  }
 0x207   : > { %1431 = vmatmul.mubr.msk.bf16.vlgmr.msra.gmra.mxu1 %vm415_vm0, %v804_v48  ;;  %v1505_v48 = vld [vmem:[%s1909_s4 + $0x8] sm:$0xff]   ;;  %1440 = vmatprep.subr.bf16.mxu0 %v1504_v44 }
 0x208   : > { %1521 = vpow2.f32 %v688_v50  ;;  %1458 = vmatpush3.bf16.msra.mxu1 %v1503_v45  ;;  %1441 = vmatpush3.bf16.msra.mxu0 %v1504_v44 }
 0x209   : > { %713 = vadd.xlane.f32.xlu0 %v712_v22  ;;  %1523 = vpow2.f32 %v612_v1  ;;  %1455 = vmatprep.subr.bf16.mxu1 %v1504_v44 }
 0x20a   : > { %1525 = vpow2.f32 %v610_v4  ;;  %1442 = vmatprep.subr.bf16.mxu0 %v1505_v48 }
 0x20b   : > { %1527 = vpow2.f32 %v614_v5 }
 0x20c   : > { %1529 = vpow2.f32 %v616_v36  ;;  %1459 = vmatpush3.bf16.msra.mxu1 %v1504_v44  ;;  %1443 = vmatpush3.bf16.msra.mxu0 %v1505_v48 }
 0x20d   : > { %v1516_v51 = vpop.eup %1515  ;;  %1531 = vpow2.f32 %v618_v41  ;;  %1456 = vmatprep.subr.bf16.mxu1 %v1505_v48 }
 0x20e   : > { %v718_v54 = vsel %vm415_vm0, %v1516_v51, 0.0  ;;  %v1518_v58 = vpop.eup %1517  ;;  %1533 = vpow2.f32 %v620_v29 }
 0x20f   : > { %719 = vadd.xlane.f32.xlu0 %v718_v54  ;;  %v724_v60 = vsel %vm415_vm0, %v1518_v58, 0.0  ;;  %1535 = vpow2.f32 %v622_v27  ;;  %v749_v27 = vld [vmem:[#allocation4 + $0x10] sm:$0xff] }
 0x210   : > { %1537 = vpow2.f32 %v624_v30  ;;  %1460 = vmatpush3.bf16.msra.mxu1 %v1505_v48 }
 0x211   : > { %v1520_v20 = vpop.eup %1519 }
 0x212   : > { %v721_v62 = vsel %vm415_vm0, %v1520_v20, 0.0  ;;  %v805_v63 = vpack.c.bf16 %v1520_v20, %v1516_v51  ;;  %v1506_v20 = vld [vmem:[%s1909_s4] sm:$0xff]  }
 0x213   : > { %725 = vadd.xlane.f32.xlu0 %v724_v60  ;;  %722 = vadd.xlane.f32.xlu1 %v721_v62 }
 0x214   : > { %1434 = vmatprep.mubr.msk.bf16.mxu1 %vm415_vm0, %v805_v63  ;;  %1444 = vmatprep.subr.bf16.mxu0 %v1506_v20 }
 0x215   : > { %v1522_v0 = vpop.eup %1521  ;;  %1445 = vmatpush3.bf16.msra.mxu0 %v1506_v20  ;;  %1457 = vmatprep.subr.bf16.mxu1 %v1506_v20 }
 0x216   : > { %v727_v2 = vsel %vm415_vm0, %v1522_v0, 0.0  ;;  %v806_v3 = vpack.c.bf16 %v1522_v0, %v1518_v58  ;;  %v1524_v32 = vpop.eup %1523  ;;  %1461 = vmatpush3.bf16.msra.mxu1 %v1506_v20 }
 0x217   : > { %728 = vadd.xlane.f32.xlu1 %v727_v2  ;;  %v1526_v33 = vpop.eup %1525  ;;  %v699_v61 = vmul.f32 %v1524_v32, %v691_v55 }
 0x218   : > { %1435 = vmatmul.mubr.msk.bf16.gmra.mxu1 %vm415_vm0, %v806_v3  ;;  %v1528_v34 = vpop.eup %1527  ;;  %v698_v47 = vmul.f32 %v1526_v33, %v690_v46 }
 0x219   : > { %v1530_v37 = vpop.eup %1529  ;;  %v700_v10 = vmul.f32 %v1528_v34, %v692_v7  ;;  %v751_v7 = vld [vmem:[#allocation4 + $0x20] sm:$0xff] }
 0x21a   : > { %v1532_v38 = vpop.eup %1531  ;;  %v701_v56 = vmul.f32 %v1530_v37, %v693_v52 }
 0x21b   : > { %v1534_v40 = vpop.eup %1533  ;;  %v702_v19 = vmul.f32 %v1532_v38, %v694_v11 }
 0x21c   : > { %v1536_v42 = vpop.eup %1535  ;;  %v703_v26 = vmul.f32 %v1534_v40, %v695_v23 }
 0x21d   : > { %v1538_v43 = vpop.eup %1537  ;;  %v704_v15 = vmul.f32 %v1536_v42, %v696_v13 }
 0x21e   : > { %v705_v50 = vmul.f32 %v1538_v43, %v697_v17 }
 0x228   : > { %762 = vperm.xlu1 %1490, %v1524_v32   ;;  %v747_v32 = vld [vmem:[#allocation4] sm:$0xff] }
 0x229   : > { %757 = vperm.xlu0 %1489, %v1526_v33  }
 0x22c   : > { %767 = vperm.xlu1 %1490, %v1528_v34   ;;  %v750_v34 = vld [vmem:[#allocation4 + $0x18] sm:$0xff] }
 0x22d   : > { %772 = vperm.xlu0 %1489, %v1530_v37  }
 0x230   : > { %777 = vperm.xlu1 %1490, %v1532_v38  }
 0x231   : > { %782 = vperm.xlu0 %1489, %v1534_v40  }
 0x234   : > { %787 = vperm.xlu1 %1490, %v1536_v42  }
 0x235   : > { %792 = vperm.xlu0 %1489, %v1538_v43   ;;  %v748_v43 = vld [vmem:[#allocation4 + $0x8] sm:$0xff] }
 0x288   : > { %v708_v49 = vpop.xlane.xlu1 %707 }
 0x289   : > { %v730_v53 = vadd.f32 %v708_v49, %v698_v47 }
 0x28b   : > { %739 = vst.msk [vmem:[#allocation3] sm:$0xff] %vm398_vm1, %v730_v53 }
 0x28c   : > { %v717_v57 = vpop.xlane.xlu1 %716 }
 0x28d   : > { %v733_v59 = vadd.f32 %v717_v57, %v701_v56 }
 0x28e   : > { %v711_v6 = vpop.xlane.xlu0 %710 }
 0x28f   : > { %742 = vst.msk [vmem:[#allocation3 + $0x18] sm:$0xff] %vm398_vm1, %v733_v59  ;;  %v731_v8 = vadd.f32 %v711_v6, %v699_v61  ;;  %v753_v61 = vld [vmem:[#allocation4 + $0x30] sm:$0xff] }
 0x291   : > { %740 = vst.msk [vmem:[#allocation3 + $0x8] sm:$0xff] %vm398_vm1, %v731_v8 }
 0x292   : > { %v714_v12 = vpop.xlane.xlu0 %713  ;;  %v951_v14 = vld [vmem:[#allocation3] sm:$0xff] }
 0x293   : > { %v732_v16 = vadd.f32 %v714_v12, %v700_v10  ;;  %1539 = vrcp.f32 %v951_v14  ;;  %v754_v10 = vld [vmem:[#allocation4 + $0x38] sm:$0xff] }
 0x295   : > { %741 = vst.msk [vmem:[#allocation3 + $0x10] sm:$0xff] %vm398_vm1, %v732_v16 }
 0x296   : > { %v954_v25 = vld [vmem:[#allocation3 + $0x18] sm:$0xff] }
 0x298   : > { %v720_v21 = vpop.xlane.xlu0 %719  ;;  %v952_v9 = vld [vmem:[#allocation3 + $0x8] sm:$0xff] }
 0x299   : > { %v734_v24 = vadd.f32 %v720_v21, %v702_v19  ;;  %1541 = vrcp.f32 %v952_v9  ;;  %v752_v19 = vld [vmem:[#allocation4 + $0x28] sm:$0xff] }
 0x29a   : > { %1543 = vrcp.f32 %v954_v25 }
 0x29b   : > { %743 = vst.msk [vmem:[#allocation3 + $0x20] sm:$0xff] %vm398_vm1, %v734_v24 }
 0x29c   : > { %v726_v28 = vpop.xlane.xlu0 %725  ;;  %v723_v31 = vpop.xlane.xlu1 %722  ;;  %v953_v35 = vld [vmem:[#allocation3 + $0x10] sm:$0xff] }
 0x29d   : > { %v736_v18 = vadd.f32 %v726_v28, %v704_v15  ;;  %v735_v39 = vadd.f32 %v723_v31, %v703_v26  ;;  %1545 = vrcp.f32 %v953_v35 }
 0x29f   : > { %745 = vst.msk [vmem:[#allocation3 + $0x30] sm:$0xff] %vm398_vm1, %v736_v18  ;;  %744 = vst.msk [vmem:[#allocation3 + $0x28] sm:$0xff] %vm398_vm1, %v735_v39 }
 0x2a0   : > { %v1540_v22 = vpop.eup %1539  ;;  %v729_v51 = vpop.xlane.xlu1 %728 }
 0x2a1   : > { %v737_v54 = vadd.f32 %v729_v51, %v705_v50  ;;  %969 = vperm.xlu1 %1490, %v1540_v22  }
 0x2a2   : > { %v955_v58 = vld [vmem:[#allocation3 + $0x20] sm:$0xff] }
 0x2a3   : > { %746 = vst.msk [vmem:[#allocation3 + $0x38] sm:$0xff] %vm398_vm1, %v737_v54  ;;  %1547 = vrcp.f32 %v955_v58 }
 0x2a4   : > { %v763_v41 = vpop.permute.xlu1 %762  ;;  %v758_v29 = vpop.permute.xlu0 %757 }
 0x2a5   : > { %v795_v40 = vmul.f32 %v758_v29, %v747_v32  ;;  %v796_v52 = vmul.f32 %v763_v41, %v748_v43 }
 0x2a6   : > { %v1542_v60 = vpop.eup %1541  ;;  %v957_v62 = vld [vmem:[#allocation3 + $0x30] sm:$0xff]  ;;  %v956_v63 = vld [vmem:[#allocation3 + $0x28] sm:$0xff] }
 0x2a7   : > { %974 = vperm.xlu0 %1489, %v1542_v60   ;;  %1549 = vrcp.f32 %v957_v62  ;;  %v1544_v0 = vpop.eup %1543 }
 0x2a8   : > { %1551 = vrcp.f32 %v956_v63  ;;  %v768_v30 = vpop.permute.xlu1 %767  ;;  %v773_v37 = vpop.permute.xlu0 %772 }
 0x2a9   : > { %v797_v33 = vmul.f32 %v768_v30, %v749_v27  ;;  %v798_v46 = vmul.f32 %v773_v37, %v750_v34 }
 0x2aa   : > { %v1546_v1 = vpop.eup %1545  ;;  %v958_v2 = vld [vmem:[#allocation3 + $0x38] sm:$0xff] }
 0x2ab   : > { %979 = vperm.xlu1 %1490, %v1546_v1   ;;  %984 = vperm.xlu0 %1489, %v1544_v0   ;;  %1553 = vrcp.f32 %v958_v2 }
 0x2ac   : > { %v778_v56 = vpop.permute.xlu1 %777  ;;  %v783_v59 = vpop.permute.xlu0 %782 }
 0x2ad   : > { %v799_v16 = vmul.f32 %v778_v56, %v751_v7  ;;  %v800_v24 = vmul.f32 %v783_v59, %v752_v19  ;;  %v1135_v59 = vld [vmem:[%s384_s28] sm:$0xff]  ;;  %v1136_v7 = vld [vmem:[%s384_s28 + $0x8] sm:$0xff] }
 0x2b0   : > { %v1548_v3 = vpop.eup %1547  ;;  %v788_v6 = vpop.permute.xlu1 %787 }
 0x2b1   : > { %989 = vperm.xlu1 %1490, %v1548_v3   ;;  %v801_v8 = vmul.f32 %v788_v6, %v753_v61  ;;  %v793_v12 = vpop.permute.xlu0 %792 }
 0x2b2   : > { %v802_v13 = vmul.f32 %v793_v12, %v754_v10  ;;  %v1137_v12 = vld [vmem:[%s384_s28 + $0x10] sm:$0xff] }
 0x2b4   : > { %v1550_v4 = vpop.eup %1549 }
 0x2b5   : > { %v1552_v5 = vpop.eup %1551  ;;  %999 = vperm.xlu1 %1490, %v1550_v4  }
 0x2b6   : > { %994 = vperm.xlu0 %1489, %v1552_v5  }
 0x2b8   : > { %v1554_v36 = vpop.eup %1553 }
 0x2ba   : > { %1004 = vperm.xlu0 %1489, %v1554_v36  }
 0x2c7   : > { %v1432_v38 = vpop.f32.mrf.mxu1 }
 0x2c8   : > { %v918_v42 = vadd.f32 %v1432_v38, %v797_v33  ;;  %v1366_v33 = vld [vmem:[%s1910_s5] ss:$0 sm:$0xff] }
 0x2c9   : > { %v885_v45 = vpop.f32.mrf.mxu1 }
 0x2ca   : > { %926 = vst.msk [vmem:[#allocation4 + $0x10] sm:$0xff] %vm415_vm0, %v918_v42  ;;  %v916_v47 = vadd.f32 %v885_v45, %v795_v40 }
 0x2cb   : > { %v1433_v49 = vpop.f32.mrf.mxu1 }
 0x2cc   : > { %924 = vst.msk [vmem:[#allocation4] sm:$0xff] %vm415_vm0, %v916_v47  ;;  %v919_v53 = vadd.f32 %v1433_v49, %v798_v46 }
 0x2cd   : > { %v888_v55 = vpop.f32.mrf.mxu1 }
 0x2ce   : > { %927 = vst.msk [vmem:[#allocation4 + $0x18] sm:$0xff] %vm415_vm0, %v919_v53  ;;  %v917_v57 = vadd.f32 %v888_v55, %v796_v52 }
 0x2d0   : > { %925 = vst.msk [vmem:[#allocation4 + $0x8] sm:$0xff] %vm415_vm0, %v917_v57 }
 0x2d1   : > { %v945_v22 = vld [vmem:[#allocation4 + $0x10] sm:$0xff] }
 0x2d3   : > { %v943_v31 = vld [vmem:[#allocation4] sm:$0xff] }
 0x2d5   : > { %v946_v48 = vld [vmem:[#allocation4 + $0x18] sm:$0xff] }
 0x2d7   : > { %v944_v35 = vld [vmem:[#allocation4 + $0x8] sm:$0xff] }
 0x2d8   : > { %v1436_v14 = vpop.f32.mrf.mxu1 }
 0x2d9   : > { %v922_v11 = vadd.f32 %v1436_v14, %v801_v8 }
 0x2da   : > { %v901_v21 = vpop.f32.mrf.mxu1 }
 0x2db   : > { %930 = vst.msk [vmem:[#allocation4 + $0x30] sm:$0xff] %vm415_vm0, %v922_v11  ;;  %v920_v23 = vadd.f32 %v901_v21, %v799_v16  ;;  %v1138_v11 = vld [vmem:[%s384_s28 + $0x18] sm:$0xff] }
 0x2dc   : > { %v1437_v9 = vpop.f32.mrf.mxu1 }
 0x2dd   : > { %928 = vst.msk [vmem:[#allocation4 + $0x20] sm:$0xff] %vm415_vm0, %v920_v23  ;;  %v923_v25 = vadd.f32 %v1437_v9, %v802_v13  ;;  %v1139_v13 = vld [vmem:[%s384_s28 + $0x20] sm:$0xff] }
 0x2de   : > { %v904_v15 = vpop.f32.mrf.mxu1 }
 0x2df   : > { %931 = vst.msk [vmem:[#allocation4 + $0x38] sm:$0xff] %vm415_vm0, %v923_v25  ;;  %v921_v26 = vadd.f32 %v904_v15, %v800_v24  ;;  %v1140_v24 = vld [vmem:[%s384_s28 + $0x28] sm:$0xff] }
 0x2e1   : > { %929 = vst.msk [vmem:[#allocation4 + $0x28] sm:$0xff] %vm415_vm0, %v921_v26  ;;  %v1141_v26 = vld [vmem:[%s384_s28 + $0x30] sm:$0xff] }
 0x2e2   : > { %v949_v5 = vld [vmem:[#allocation4 + $0x30] sm:$0xff] }
 0x2e4   : > { %v947_v62 = vld [vmem:[#allocation4 + $0x20] sm:$0xff] }
 0x2e6   : > { %v950_v36 = vld [vmem:[#allocation4 + $0x38] sm:$0xff] }
 0x2e8   : > { %v948_v63 = vld [vmem:[#allocation4 + $0x28] sm:$0xff] }
 0x31c   : > { %v970_v28 = vpop.permute.xlu1 %969 }
 0x31d   : > { %v1007_v18 = vmul.f32 %v970_v28, %v943_v31 }
 0x322   : > { %v975_v17 = vpop.permute.xlu0 %974 }
 0x323   : > { %v1008_v39 = vmul.f32 %v975_v17, %v944_v35  ;;  %v1142_v17 = vld [vmem:[%s384_s28 + $0x38] sm:$0xff] }
 0x325   : > { %v1015_v44 = vpack.c.bf16 %v1008_v39, %v1007_v18 }
 0x326   : > { %v985_v50 = vpop.permute.xlu0 %984  ;;  %v980_v51 = vpop.permute.xlu1 %979 }
 0x327   : > { %v1010_v54 = vmul.f32 %v985_v50, %v946_v48  ;;  %v1009_v58 = vmul.f32 %v980_v51, %v945_v22  ;;  %1446 = vmatprep.mubr.msk.bf16.mxu0 %vm415_vm0, %v1015_v44 }
 0x329   : > { %v1016_v20 = vpack.c.bf16 %v1010_v54, %v1009_v58 }
 0x32b   : > { %1447 = vmatmul.mubr.msk.bf16.vlgmr.msra.gmra.mxu0 %vm415_vm0, %v1016_v20 }
 0x32c   : > { %v990_v60 = vpop.permute.xlu1 %989 }
 0x32d   : > { %v1011_v1 = vmul.f32 %v990_v60, %v947_v62 }
 0x330   : > { %v1000_v3 = vpop.permute.xlu1 %999 }
 0x331   : > { %v995_v0 = vpop.permute.xlu0 %994  ;;  %v1013_v29 = vmul.f32 %v1000_v3, %v949_v5 }
 0x332   : > { %v1012_v2 = vmul.f32 %v995_v0, %v948_v63 }
 0x334   : > { %v1017_v4 = vpack.c.bf16 %v1012_v2, %v1011_v1 }
 0x335   : > { %v1005_v41 = vpop.permute.xlu0 %1004 }
 0x336   : > { %v1014_v27 = vmul.f32 %v1005_v41, %v950_v36  ;;  %1450 = vmatprep.mubr.msk.bf16.mxu1 %vm415_vm0, %v1017_v4 }
 0x338   : > { %v1018_v30 = vpack.c.bf16 %v1014_v27, %v1013_v29 }
 0x33a   : > { %1451 = vmatmul.mubr.msk.bf16.vlgmr.msra.gmra.mxu1 %vm415_vm0, %v1018_v30 }
 0x3eb   : > { %v1448_v32 = vpop.f32.mrf.mxu0 }
 0x3ec   : > { %v1113_v43 = vadd.f32 %v1448_v32, %v1366_v33 }
 0x3ed   : > { %v1104_v34 = vpop.f32.mrf.mxu0 }
 0x3ee   : > { %v1105_v37 = vadd.f32 %v1366_v33, %v1104_v34 }
 0x3ef   : > { %v1449_v38 = vpop.f32.mrf.mxu0 }
 0x3f0   : > { %1143 = vxpose.xlu1.b32.start [1/8] (short) (narrow) %v1105_v37, 64  ;;  %v1116_v45 = vadd.f32 %v1449_v38, %v1366_v33 }
 0x3f1   : > { %v1107_v40 = vpop.f32.mrf.mxu0 }
 0x3f2   : > { %v1108_v42 = vadd.f32 %v1366_v33, %v1107_v40 }
 0x3f4   : > { %1144 = vxpose.xlu1.b32.cont [2/8] (short) (narrow) %v1108_v42, 64 }
 0x3f8   : > { %1145 = vxpose.xlu1.b32.cont [3/8] (short) (narrow) %v1113_v43, 64 }
 0x3fa   : > { %v1452_v46 = vpop.f32.mrf.mxu1 }
 0x3fb   : > { %v1129_v56 = vadd.f32 %v1452_v46, %v1366_v33 }
 0x3fc   : > { %v1120_v47 = vpop.f32.mrf.mxu1  ;;  %1146 = vxpose.xlu1.b32.cont [4/8] (short) (narrow) %v1116_v45, 64 }
 0x3fd   : > { %v1121_v49 = vadd.f32 %v1366_v33, %v1120_v47 }
 0x3fe   : > { %v1453_v52 = vpop.f32.mrf.mxu1 }
 0x3ff   : > { %v1132_v57 = vadd.f32 %v1453_v52, %v1366_v33 }
 0x400   : > { %v1123_v53 = vpop.f32.mrf.mxu1  ;;  %1147 = vxpose.xlu1.b32.cont [5/8] (short) (narrow) %v1121_v49, 64 }
 0x401   : > { %v1124_v55 = vadd.f32 %v1366_v33, %v1123_v53 }
 0x404   : > { %1148 = vxpose.xlu1.b32.cont [6/8] (short) (narrow) %v1124_v55, 64 }
 0x408   : > { %1149 = vxpose.xlu1.b32.cont [7/8] (short) (narrow) %v1129_v56, 64 }
 0x40c   : > { %1150 = vxpose.xlu1.b32.end [8/8] (short) (narrow) %v1132_v57, 64 }
 0x46c   : > { %v1159_v61 = vpop.trf.xlu1 }
 0x46d   : > { %v1175_v6 = vadd.f32 %v1159_v61, %v1135_v59 }
 0x46f   : > { %1183 = vst.msk [vmem:[%s1878_s7] sm:$0xff] %vm415_vm0, %v1175_v6 }
 0x470   : > { %v1160_v8 = vpop.trf.xlu1 }
 0x471   : > { %v1176_v10 = vadd.f32 %v1160_v8, %v1136_v7 }
 0x473   : > { %1184 = vst.msk [vmem:[%s1878_s7 + $0x8] sm:$0xff] %vm415_vm0, %v1176_v10 }
 0x474   : > { %v1161_v14 = vpop.trf.xlu1 }
 0x475   : > { %v1177_v16 = vadd.f32 %v1161_v14, %v1137_v12 }
 0x477   : > { %1185 = vst.msk [vmem:[%s1878_s7 + $0x10] sm:$0xff] %vm415_vm0, %v1177_v16 }
 0x478   : > { %v1162_v19 = vpop.trf.xlu1 }
 0x479   : > { %v1178_v21 = vadd.f32 %v1162_v19, %v1138_v11 }
 0x47b   : > { %1186 = vst.msk [vmem:[%s1878_s7 + $0x18] sm:$0xff] %vm415_vm0, %v1178_v21 }
 0x47c   : > { %v1163_v23 = vpop.trf.xlu1 }
 0x47d   : > { %v1179_v9 = vadd.f32 %v1163_v23, %v1139_v13 }
 0x47f   : > { %1187 = vst.msk [vmem:[%s1878_s7 + $0x20] sm:$0xff] %vm415_vm0, %v1179_v9 }
 0x480   : > { %v1164_v25 = vpop.trf.xlu1 }
 0x481   : > { %v1180_v15 = vadd.f32 %v1164_v25, %v1140_v24 }
 0x483   : > { %1188 = vst.msk [vmem:[%s1878_s7 + $0x28] sm:$0xff] %vm415_vm0, %v1180_v15 }
 0x484   : > { %v1165_v28 = vpop.trf.xlu1 }
 0x485   : > { %v1181_v31 = vadd.f32 %v1165_v28, %v1141_v26 }
 0x487   : > { %1189 = vst.msk [vmem:[%s1878_s7 + $0x30] sm:$0xff] %vm415_vm0, %v1181_v31 }
 0x488   : > { %v1166_v35 = vpop.trf.xlu1 }
 0x489   : > { %v1182_v18 = vadd.f32 %v1166_v35, %v1142_v17 }
 0x48b   : > { %1190 = vst.msk [vmem:[%s1878_s7 + $0x38] sm:$0xff] %vm415_vm0, %v1182_v18 }
 0x48c PF: > { %s16_s23 = sadd.s32 1, %s1577_s23   ;;  %s1912_s21 = smov %s1573_s22 }
 0x48d   : > { %p13_p5 = scmp.ge.s32.totalorder %s16_s23, 4   ;;  %s1913_s22 = smov %s1915_s24 }
 0x48f   :  { %15 = sbr.rel (!%p13_p5) target bundleno = 2 (0x2), region = 91 }

</bundles_post_ra>
